<compile_context>
chip_gen: v7x
topology: tpu7x:2x2x1
jax: 0.10.0
libtpu: 0.0.40
codegen_flags: <defaults>
</compile_context>

<pallas_src>
import math
from functools import partial

import jax
import jax.numpy as jnp
from jax.experimental import pallas as pl
from jax.experimental.pallas import tpu as pltpu

LN_EPS = 1e-5          # PyTorch nn.LayerNorm default
_MIB = 1024 * 1024


def _layernorm_f32(v, w, b):
    """fp32 LayerNorm (matches the fp16-safe LayerNorm subclass)."""
    mean = jnp.mean(v, axis=-1, keepdims=True)
    var = jnp.mean((v - mean) ** 2, axis=-1, keepdims=True)
    return (v - mean) * jax.lax.rsqrt(var + LN_EPS) * w + b


def residual_attention_block_kernel(
    x_ref,       # (1, L, D)   current batch element (fp32)
    ln1_ref,     # (2, D)      fp32 [weight; bias]
    w_in_ref,    # (D, 3D)     bf16, pre-transposed in_proj_weight
    b_in_ref,    # (1, 3D)     fp32
    w_out_ref,   # (D, D)      bf16, pre-transposed out_proj.weight
    b_out_ref,   # (1, D)      fp32
    ln2_ref,     # (2, D)      fp32
    w_fc_ref,    # (D, 4D)     bf16, pre-transposed mlp.c_fc.weight
    b_fc_ref,    # (1, 4D)     fp32
    w_proj_ref,  # (4D, D)     bf16, pre-transposed mlp.c_proj.weight
    b_proj_ref,  # (1, D)      fp32
    y_ref,       # (1, L, D)   output
    *rest,       # [attn_ref (1, L, L)] , qkv_sc (3, H, L, dh) bf16, ctx_sc (L, D) bf16
    num_heads, return_attention,
):
    if return_attention:
        attn_ref, qkv_sc, ctx_sc = rest
    else:
        qkv_sc, ctx_sc = rest

    x = x_ref[0].astype(jnp.float32)                 # (L, D)
    L, D = x.shape
    H = num_heads
    dh = D // H
    scale = 1.0 / math.sqrt(dh)

    # ---- ln_1 (fp32) ----
    xn = _layernorm_f32(x, ln1_ref[0, :], ln1_ref[1, :])

    # ---- fused QKV projection: bf16 MXU operands, fp32 accumulation ----
    qkv = jnp.dot(xn.astype(jnp.bfloat16), w_in_ref[...],
                  preferred_element_type=jnp.float32) + b_in_ref[0, :]      # (L, 3D)

    # Head split via cheap static-slice stores into VMEM scratch (no reshape /
    # lane concat); q is pre-scaled by 1/sqrt(dh) like nn.MultiheadAttention.
    for h in range(H):                       # static unroll: slice copies only
        lo = h * dh
        qkv_sc[0, h, :, :] = (qkv[:, lo:lo + dh] * scale).astype(jnp.bfloat16)
        qkv_sc[1, h, :, :] = qkv[:, D + lo:D + lo + dh].astype(jnp.bfloat16)
        qkv_sc[2, h, :, :] = qkv[:, 2 * D + lo:2 * D + lo + dh].astype(jnp.bfloat16)

    q3 = qkv_sc[0]                                   # (H, L, dh) bf16
    k3 = qkv_sc[1]
    v3 = qkv_sc[2]

    # TODO(synk): attn_mask is always None for this module's usage; masked path
    # is not implemented.
    # Batched-head attention: two MXU einsums instead of 2*H unrolled dots.
    s = jnp.einsum("hqd,hkd->hqk", q3, k3,
                   preferred_element_type=jnp.float32)                      # (H, L, L)
    s = s - jnp.max(s, axis=-1, keepdims=True)       # stable softmax, fp32
    p = jnp.exp(s)
    p = p * pl.reciprocal(jnp.sum(p, axis=-1, keepdims=True), approx=True)  # EUP

    ctx = jnp.einsum("hqk,hkd->hqd", p.astype(jnp.bfloat16), v3,
                     preferred_element_type=jnp.float32)                    # (H, L, dh)

    # Head merge via static-slice stores into (L, D) scratch (no lane concat).
    for h in range(H):
        lo = h * dh
        ctx_sc[:, lo:lo + dh] = ctx[h].astype(jnp.bfloat16)

    attn_out = (jnp.dot(ctx_sc[...], w_out_ref[...],
                        preferred_element_type=jnp.float32) + b_out_ref[0, :])

    x = x + attn_out                                 # residual 1 (fp32)

    # ---- ln_2 + MLP (Linear -> QuickGELU -> Linear) ----
    xn2 = _layernorm_f32(x, ln2_ref[0, :], ln2_ref[1, :])
    hmid = (jnp.dot(xn2.astype(jnp.bfloat16), w_fc_ref[...],
                    preferred_element_type=jnp.float32) + b_fc_ref[0, :])   # (L, 4D)
    hmid = hmid * jax.nn.sigmoid(1.702 * hmid)       # QuickGELU (fp32, EUP sigmoid)
    mlp_out = (jnp.dot(hmid.astype(jnp.bfloat16), w_proj_ref[...],
                       preferred_element_type=jnp.float32) + b_proj_ref[0, :])

    x = x + mlp_out                                  # residual 2

    y_ref[0] = x.astype(y_ref.dtype)

    if return_attention:
        # head-averaged attention weights (average_attn_weights=True semantics)
        attn_ref[0] = (jnp.sum(p, axis=0) * (1.0 / H)).astype(attn_ref.dtype)


def _vmem_limit_bytes(L, D, H):
    """Scoped VMEM request sized from the actual tile footprint (+ headroom)."""
    bf16, f32 = 2, 4
    dh = D // H
    weights = (D * 3 * D + D * D + D * 4 * D + 4 * D * D) * bf16 * 2  # double-buffered
    small = (2 * 2 * D + 3 * D + D + 4 * D + D) * f32 * 2
    io_blocks = (2 * L * D * f32 + L * L * f32) * 2                   # x / y / attn tiles
    scratch = (3 * H * L * dh + L * D) * bf16
    acts = (L * 3 * D + L * 4 * D + 4 * L * D) * f32 + 3 * H * L * L * f32
    est = weights + small + io_blocks + scratch + acts
    return int(min(64 * _MIB, max(32 * _MIB, 2 * est)))


def residual_attention_block(x_nld, layer_params, num_heads, return_attention):
    """One ResidualAttentionBlock.  x_nld: (N, L, D) -> (y, attn_or_None)."""
    N, L, D = x_nld.shape
    H = num_heads
    dh = D // H
    kernel = partial(residual_attention_block_kernel,
                     num_heads=num_heads, return_attention=return_attention)

    def const_spec(shape):
        # Constant index_map: block never changes across the batch grid, so it
        # is only DMA'd once (the pipeline still reserves its default buffers).
        # TODO(synk): at production widths (D>=768) single-buffer / stream the
        # weight tiles (K-chunked MLP grid) to fit v7x's 64 MiB VMEM.
        n = len(shape)
        return pl.BlockSpec(shape, lambda b, _n=n: (0,) * _n)

    in_specs = [
        pl.BlockSpec((1, L, D), lambda b: (b, 0, 0)),   # x: one batch element / step
        const_spec((2, D)),           # ln1 (w, b)
        const_spec((D, 3 * D)),       # in_proj weight (pre-transposed, bf16)
        const_spec((1, 3 * D)),       # in_proj bias
        const_spec((D, D)),           # out_proj weight (pre-transposed, bf16)
        const_spec((1, D)),           # out_proj bias
        const_spec((2, D)),           # ln2 (w, b)
        const_spec((D, 4 * D)),       # c_fc weight (pre-transposed, bf16)
        const_spec((1, 4 * D)),       # c_fc bias
        const_spec((4 * D, D)),       # c_proj weight (pre-transposed, bf16)
        const_spec((1, D)),           # c_proj bias
    ]
    out_shape = [jax.ShapeDtypeStruct((N, L, D), x_nld.dtype)]
    out_specs = [pl.BlockSpec((1, L, D), lambda b: (b, 0, 0))]
    if return_attention:
        out_shape.append(jax.ShapeDtypeStruct((N, L, L), jnp.float32))
        out_specs.append(pl.BlockSpec((1, L, L), lambda b: (b, 0, 0)))

    scratch_shapes = [
        pltpu.VMEM((3, H, L, dh), jnp.bfloat16),   # q/k/v split by head
        pltpu.VMEM((L, D), jnp.bfloat16),          # merged attention context
    ]

    outs = pl.pallas_call(
        kernel,
        out_shape=tuple(out_shape),
        grid_spec=pltpu.PrefetchScalarGridSpec(
            num_scalar_prefetch=0,
            grid=(N,),
            in_specs=in_specs,
            out_specs=tuple(out_specs),
            scratch_shapes=scratch_shapes,
        ),
        compiler_params=pltpu.CompilerParams(
            dimension_semantics=("parallel",),       # batch elements independent
            vmem_limit_bytes=_vmem_limit_bytes(L, D, H),
        ),
    )(x_nld, *layer_params)

    if return_attention:
        y, attn = outs
        return y, attn
    return outs[0], None


def transformer_for_clip(x_lnd, params, num_heads):
    """Forward of TransformerForCLIP.

    x_lnd: (L, N, D) seq-first (PyTorch CLIP convention).
    Returns (x (L,N,D), attention (N,L,L) from the final block, z: list of (N,L,D)).
    """
    x_nld = jnp.transpose(x_lnd, (1, 0, 2))           # (N, L, D)
    z = []
    attention = None
    n_layers = len(params)
    for idx, layer_params in enumerate(params):
        is_last = idx == n_layers - 1                 # only last block returns attention
        x_nld, attn = residual_attention_block(
            x_nld, layer_params, num_heads, return_attention=is_last)
        if is_last:
            attention = attn
        z.append(x_nld)                               # == x.permute(1, 0, 2)
    x_out = jnp.transpose(x_nld, (1, 0, 2))           # back to (L, N, D)
    return x_out, attention, z


# ----------------------------------------------------------------------------
# Parameter construction (PyTorch layout) + kernel-layout preparation
# ----------------------------------------------------------------------------
def init_params_torch_layout(key, width, layers):
    """Deterministic synthetic parameters in the PyTorch module's layout."""
    D = width
    params = []
    for i in range(layers):
        keys = jax.random.split(jax.random.fold_in(key, i), 6)
        params.append(dict(
            ln1_w=jnp.ones((D,), jnp.float32), ln1_b=jnp.zeros((D,), jnp.float32),
            in_proj_w=0.02 * jax.random.normal(keys[0], (3 * D, D), jnp.float32),
            in_proj_b=jnp.zeros((3 * D,), jnp.float32),
            out_proj_w=0.02 * jax.random.normal(keys[1], (D, D), jnp.float32),
            out_proj_b=jnp.zeros((D,), jnp.float32),
            ln2_w=jnp.ones((D,), jnp.float32), ln2_b=jnp.zeros((D,), jnp.float32),
            c_fc_w=0.02 * jax.random.normal(keys[2], (4 * D, D), jnp.float32),
            c_fc_b=0.02 * jax.random.normal(keys[3], (4 * D,), jnp.float32),
            c_proj_w=0.02 * jax.random.normal(keys[4], (D, 4 * D), jnp.float32),
            c_proj_b=0.02 * jax.random.normal(keys[5], (D,), jnp.float32),
        ))
    return params


def prepare_layer_params(p):
    """Pre-transpose matmul weights (kernel does x @ W, no in-kernel .T) and cast
    them to bf16 (MXU operands).  LayerNorm params and biases stay fp32."""
    ln1 = jnp.stack([p["ln1_w"], p["ln1_b"]]).astype(jnp.float32)       # (2, D)
    ln2 = jnp.stack([p["ln2_w"], p["ln2_b"]]).astype(jnp.float32)
    w_in = jnp.transpose(p["in_proj_w"]).astype(jnp.bfloat16)           # (D, 3D)
    w_out = jnp.transpose(p["out_proj_w"]).astype(jnp.bfloat16)         # (D, D)
    w_fc = jnp.transpose(p["c_fc_w"]).astype(jnp.bfloat16)              # (D, 4D)
    w_proj = jnp.transpose(p["c_proj_w"]).astype(jnp.bfloat16)          # (4D, D)
    b_in = p["in_proj_b"].reshape(1, -1).astype(jnp.float32)
    b_out = p["out_proj_b"].reshape(1, -1).astype(jnp.float32)
    b_fc = p["c_fc_b"].reshape(1, -1).astype(jnp.float32)
    b_proj = p["c_proj_b"].reshape(1, -1).astype(jnp.float32)
    return (ln1, w_in, b_in, w_out, b_out, ln2, w_fc, b_fc, w_proj, b_proj)


# ----------------------------------------------------------------------------
# Pure-JAX fp32 reference (for correctness check only)
# ----------------------------------------------------------------------------
def _reference_block(x_nld, p, num_heads):
    N, L, D = x_nld.shape
    dh = D // num_heads

    def ln(v, w, b):
        m = jnp.mean(v, -1, keepdims=True)
        var = jnp.mean((v - m) ** 2, -1, keepdims=True)
        return (v - m) * jax.lax.rsqrt(var + LN_EPS) * w + b

    xn = ln(x_nld, p["ln1_w"], p["ln1_b"])
    qkv = xn @ p["in_proj_w"].T + p["in_proj_b"]
    q, k, v = jnp.split(qkv, 3, axis=-1)
    sh = lambda t: t.reshape(N, L, num_heads, dh).transpose(0, 2, 1, 3)   # (N,H,L,dh)
    qh, kh, vh = sh(q), sh(k), sh(v)
    s = jnp.einsum("nhqd,nhkd->nhqk", qh, kh) / math.sqrt(dh)
    pattn = jax.nn.softmax(s, axis=-1)
    ctx = jnp.einsum("nhqk,nhkd->nhqd", pattn, vh).transpose(0, 2, 1, 3).reshape(N, L, D)
    x = x_nld + (ctx @ p["out_proj_w"].T + p["out_proj_b"])
    xn2 = ln(x, p["ln2_w"], p["ln2_b"])
    h = xn2 @ p["c_fc_w"].T + p["c_fc_b"]
    h = h * jax.nn.sigmoid(1.702 * h)
    x = x + (h @ p["c_proj_w"].T + p["c_proj_b"])
    return x, jnp.mean(pattn, axis=1)


def _reference_forward(x_lnd, torch_params, num_heads):
    x = jnp.transpose(x_lnd, (1, 0, 2))
    attention, z = None, []
    for i, p in enumerate(torch_params):
        x, attn = _reference_block(x, p, num_heads)
        if i == len(torch_params) - 1:
            attention = attn
        z.append(x)
    return jnp.transpose(x, (1, 0, 2)), attention, z


if __name__ == "__main__":
    # Small shapes: seq L=8, batch N=2, width D=32, heads=4, layers=2.
    L, N, D, HEADS, LAYERS = 8, 2, 32, 4, 2

    key = jax.random.PRNGKey(0)
    xkey, pkey = jax.random.split(key)
    x = jax.random.normal(xkey, (L, N, D), jnp.float32)
    torch_params = init_params_torch_layout(pkey, D, LAYERS)
    params = [prepare_layer_params(p) for p in torch_params]   # one-time layout/cast

    fwd = jax.jit(partial(transformer_for_clip, num_heads=HEADS))
    x_out, attention, z = fwd(x, params)
    jax.block_until_ready((x_out, attention, z))

    # shape / sanity checks
    assert x_out.shape == (L, N, D)
    assert attention.shape == (N, L, L)
    assert len(z) == LAYERS and all(zi.shape == (N, L, D) for zi in z)
    assert bool(jnp.all(jnp.isfinite(x_out)))
    assert bool(jnp.all(jnp.isfinite(attention)))

    # numerical check against a pure-JAX fp32 reference (bf16 MXU tolerance)
    x_ref, attn_ref, _ = _reference_forward(x, torch_params, HEADS)
    assert jnp.allclose(x_out, x_ref, atol=5e-2, rtol=5e-2)
    assert jnp.allclose(attention, attn_ref, atol=2e-2, rtol=5e-2)

    print("KERNEL_OK")
</pallas_src>

<mosaic_0001>
module attributes {stable_mosaic.version = 11 : i64} {
  func.func @residual_attention_block_kernel(%arg0: i32, %arg1: memref<1x8x32xf32, #tpu.memory_space<vmem>>, %arg2: memref<2x32xf32, #tpu.memory_space<vmem>>, %arg3: memref<32x96xbf16, #tpu.memory_space<vmem>>, %arg4: memref<1x96xf32, #tpu.memory_space<vmem>>, %arg5: memref<32x32xbf16, #tpu.memory_space<vmem>>, %arg6: memref<1x32xf32, #tpu.memory_space<vmem>>, %arg7: memref<2x32xf32, #tpu.memory_space<vmem>>, %arg8: memref<32x128xbf16, #tpu.memory_space<vmem>>, %arg9: memref<1x128xf32, #tpu.memory_space<vmem>>, %arg10: memref<128x32xbf16, #tpu.memory_space<vmem>>, %arg11: memref<1x32xf32, #tpu.memory_space<vmem>>, %arg12: memref<1x8x32xf32, #tpu.memory_space<vmem>>, %arg13: memref<3x4x8x8xbf16, #tpu.memory_space<vmem>>, %arg14: memref<8x32xbf16, #tpu.memory_space<vmem>>) attributes {dimension_semantics = [#tpu.dimension_semantics<parallel>], iteration_bounds = array<i64: 2>, scalar_prefetch = 0 : i64, scratch_operands = 2 : i64, tpu.core_type = #tpu.core_type<tc>, window_params = [{transform_indices = @transform_0, window_bounds = array<i64: 1, 8, 32>}, {pipeline_mode = #tpu.pipeline_mode<synchronous>, transform_indices = @transform_1, window_bounds = array<i64: 2, 32>}, {pipeline_mode = #tpu.pipeline_mode<synchronous>, transform_indices = @transform_2, window_bounds = array<i64: 32, 96>}, {pipeline_mode = #tpu.pipeline_mode<synchronous>, transform_indices = @transform_3, window_bounds = array<i64: 1, 96>}, {pipeline_mode = #tpu.pipeline_mode<synchronous>, transform_indices = @transform_4, window_bounds = array<i64: 32, 32>}, {pipeline_mode = #tpu.pipeline_mode<synchronous>, transform_indices = @transform_5, window_bounds = array<i64: 1, 32>}, {pipeline_mode = #tpu.pipeline_mode<synchronous>, transform_indices = @transform_6, window_bounds = array<i64: 2, 32>}, {pipeline_mode = #tpu.pipeline_mode<synchronous>, transform_indices = @transform_7, window_bounds = array<i64: 32, 128>}, {pipeline_mode = #tpu.pipeline_mode<synchronous>, transform_indices = @transform_8, window_bounds = array<i64: 1, 128>}, {pipeline_mode = #tpu.pipeline_mode<synchronous>, transform_indices = @transform_9, window_bounds = array<i64: 128, 32>}, {pipeline_mode = #tpu.pipeline_mode<synchronous>, transform_indices = @transform_10, window_bounds = array<i64: 1, 32>}, {transform_indices = @transform_11, window_bounds = array<i64: 1, 8, 32>}]} {
    %c0 = arith.constant 0 : index
    %c0_0 = arith.constant 0 : index
    %c0_1 = arith.constant 0 : index
    %0 = vector.load %arg1[%c0, %c0_0, %c0_1] : memref<1x8x32xf32, #tpu.memory_space<vmem>>, vector<1x8x32xf32>
    %1 = vector.shape_cast %0 : vector<1x8x32xf32> to vector<8x32xf32>
    %c0_2 = arith.constant 0 : index
    %c0_3 = arith.constant 0 : index
    %2 = vector.load %arg2[%c0_2, %c0_3] : memref<2x32xf32, #tpu.memory_space<vmem>>, vector<1x32xf32>
    %3 = vector.shape_cast %2 : vector<1x32xf32> to vector<32xf32>
    %c1 = arith.constant 1 : index
    %c0_4 = arith.constant 0 : index
    %4 = vector.load %arg2[%c1, %c0_4] : memref<2x32xf32, #tpu.memory_space<vmem>>, vector<1x32xf32>
    %5 = vector.shape_cast %4 : vector<1x32xf32> to vector<32xf32>
    %cst = arith.constant dense<0.000000e+00> : vector<8xf32>
    %6 = vector.multi_reduction <add>, %1, %cst [1] : vector<8x32xf32> to vector<8xf32>
    %7 = vector.shape_cast %6 : vector<8xf32> to vector<8x1xf32>
    %cst_5 = arith.constant 3.200000e+01 : f32
    %8 = vector.broadcast %cst_5 : f32 to vector<8x1xf32>
    %9 = arith.divf %7, %8 : vector<8x1xf32>
    %10 = vector.broadcast %9 : vector<8x1xf32> to vector<8x32xf32>
    %11 = arith.subf %1, %10 : vector<8x32xf32>
    %12 = arith.mulf %11, %11 : vector<8x32xf32>
    %cst_6 = arith.constant dense<0.000000e+00> : vector<8xf32>
    %13 = vector.multi_reduction <add>, %12, %cst_6 [1] : vector<8x32xf32> to vector<8xf32>
    %14 = vector.shape_cast %13 : vector<8xf32> to vector<8x1xf32>
    %cst_7 = arith.constant 3.200000e+01 : f32
    %15 = vector.broadcast %cst_7 : f32 to vector<8x1xf32>
    %16 = arith.divf %14, %15 : vector<8x1xf32>
    %17 = vector.broadcast %9 : vector<8x1xf32> to vector<8x32xf32>
    %18 = arith.subf %1, %17 : vector<8x32xf32>
    %cst_8 = arith.constant 9.99999974E-6 : f32
    %19 = vector.broadcast %cst_8 : f32 to vector<8x1xf32>
    %20 = arith.addf %16, %19 : vector<8x1xf32>
    %21 = math.rsqrt %20 : vector<8x1xf32>
    %22 = vector.broadcast %21 : vector<8x1xf32> to vector<8x32xf32>
    %23 = arith.mulf %18, %22 : vector<8x32xf32>
    %24 = vector.shape_cast %3 : vector<32xf32> to vector<1x32xf32>
    %25 = vector.broadcast %24 : vector<1x32xf32> to vector<8x32xf32>
    %26 = arith.mulf %23, %25 : vector<8x32xf32>
    %27 = vector.shape_cast %5 : vector<32xf32> to vector<1x32xf32>
    %28 = vector.broadcast %27 : vector<1x32xf32> to vector<8x32xf32>
    %29 = arith.addf %26, %28 : vector<8x32xf32>
    %30 = arith.truncf %29 : vector<8x32xf32> to vector<8x32xbf16>
    %c0_9 = arith.constant 0 : index
    %c0_10 = arith.constant 0 : index
    %31 = vector.load %arg3[%c0_9, %c0_10] : memref<32x96xbf16, #tpu.memory_space<vmem>>, vector<32x96xbf16>
    %cst_11 = arith.constant dense<0.000000e+00> : vector<8x96xf32>
    %32 = tpu.matmul %30, %31, %cst_11 {dimension_numbers = #tpu.dot_dimension_numbers<[1], [0], [0], [1], [0, 0, 1, 1], [], []>} : vector<8x32xbf16>, vector<32x96xbf16>, vector<8x96xf32> -> vector<8x96xf32>
    %c0_12 = arith.constant 0 : index
    %c0_13 = arith.constant 0 : index
    %33 = vector.load %arg4[%c0_12, %c0_13] : memref<1x96xf32, #tpu.memory_space<vmem>>, vector<1x96xf32>
    %34 = vector.shape_cast %33 : vector<1x96xf32> to vector<96xf32>
    %35 = vector.shape_cast %34 : vector<96xf32> to vector<1x96xf32>
    %36 = vector.broadcast %35 : vector<1x96xf32> to vector<8x96xf32>
    %37 = arith.addf %32, %36 : vector<8x96xf32>
    %38 = vector.extract_strided_slice %37 {offsets = [0, 0], sizes = [8, 8], strides = [1, 1]} : vector<8x96xf32> to vector<8x8xf32>
    %cst_14 = arith.constant 0.353553385 : f32
    %39 = vector.broadcast %cst_14 : f32 to vector<8x8xf32>
    %40 = arith.mulf %38, %39 : vector<8x8xf32>
    %41 = arith.truncf %40 : vector<8x8xf32> to vector<8x8xbf16>
    %c0_15 = arith.constant 0 : index
    %c0_16 = arith.constant 0 : index
    %c0_17 = arith.constant 0 : index
    %c0_18 = arith.constant 0 : index
    %42 = vector.load %arg13[%c0_15, %c0_16, %c0_17, %c0_18] : memref<3x4x8x8xbf16, #tpu.memory_space<vmem>>, vector<1x1x8x8xbf16>
    %43 = vector.shape_cast %42 : vector<1x1x8x8xbf16> to vector<8x8xbf16>
    %44 = vector.shape_cast %41 : vector<8x8xbf16> to vector<1x1x8x8xbf16>
    tpu.vector_store %arg13[%c0_15, %c0_16, %c0_17, %c0_18], %44 {strides = array<i32>} : memref<3x4x8x8xbf16, #tpu.memory_space<vmem>>, vector<1x1x8x8xbf16>,
    %45 = vector.extract_strided_slice %37 {offsets = [0, 32], sizes = [8, 8], strides = [1, 1]} : vector<8x96xf32> to vector<8x8xf32>
    %46 = arith.truncf %45 : vector<8x8xf32> to vector<8x8xbf16>
    %c1_19 = arith.constant 1 : index
    %c0_20 = arith.constant 0 : index
    %c0_21 = arith.constant 0 : index
    %c0_22 = arith.constant 0 : index
    %47 = vector.load %arg13[%c1_19, %c0_20, %c0_21, %c0_22] : memref<3x4x8x8xbf16, #tpu.memory_space<vmem>>, vector<1x1x8x8xbf16>
    %48 = vector.shape_cast %47 : vector<1x1x8x8xbf16> to vector<8x8xbf16>
    %49 = vector.shape_cast %46 : vector<8x8xbf16> to vector<1x1x8x8xbf16>
    tpu.vector_store %arg13[%c1_19, %c0_20, %c0_21, %c0_22], %49 {strides = array<i32>} : memref<3x4x8x8xbf16, #tpu.memory_space<vmem>>, vector<1x1x8x8xbf16>,
    %50 = vector.extract_strided_slice %37 {offsets = [0, 64], sizes = [8, 8], strides = [1, 1]} : vector<8x96xf32> to vector<8x8xf32>
    %51 = arith.truncf %50 : vector<8x8xf32> to vector<8x8xbf16>
    %c2 = arith.constant 2 : index
    %c0_23 = arith.constant 0 : index
    %c0_24 = arith.constant 0 : index
    %c0_25 = arith.constant 0 : index
    %52 = vector.load %arg13[%c2, %c0_23, %c0_24, %c0_25] : memref<3x4x8x8xbf16, #tpu.memory_space<vmem>>, vector<1x1x8x8xbf16>
    %53 = vector.shape_cast %52 : vector<1x1x8x8xbf16> to vector<8x8xbf16>
    %54 = vector.shape_cast %51 : vector<8x8xbf16> to vector<1x1x8x8xbf16>
    tpu.vector_store %arg13[%c2, %c0_23, %c0_24, %c0_25], %54 {strides = array<i32>} : memref<3x4x8x8xbf16, #tpu.memory_space<vmem>>, vector<1x1x8x8xbf16>,
    %55 = vector.extract_strided_slice %37 {offsets = [0, 8], sizes = [8, 8], strides = [1, 1]} : vector<8x96xf32> to vector<8x8xf32>
    %cst_26 = arith.constant 0.353553385 : f32
    %56 = vector.broadcast %cst_26 : f32 to vector<8x8xf32>
    %57 = arith.mulf %55, %56 : vector<8x8xf32>
    %58 = arith.truncf %57 : vector<8x8xf32> to vector<8x8xbf16>
    %c0_27 = arith.constant 0 : index
    %c1_28 = arith.constant 1 : index
    %c0_29 = arith.constant 0 : index
    %c0_30 = arith.constant 0 : index
    %59 = vector.load %arg13[%c0_27, %c1_28, %c0_29, %c0_30] : memref<3x4x8x8xbf16, #tpu.memory_space<vmem>>, vector<1x1x8x8xbf16>
    %60 = vector.shape_cast %59 : vector<1x1x8x8xbf16> to vector<8x8xbf16>
    %61 = vector.shape_cast %58 : vector<8x8xbf16> to vector<1x1x8x8xbf16>
    tpu.vector_store %arg13[%c0_27, %c1_28, %c0_29, %c0_30], %61 {strides = array<i32>} : memref<3x4x8x8xbf16, #tpu.memory_space<vmem>>, vector<1x1x8x8xbf16>,
    %62 = vector.extract_strided_slice %37 {offsets = [0, 40], sizes = [8, 8], strides = [1, 1]} : vector<8x96xf32> to vector<8x8xf32>
    %63 = arith.truncf %62 : vector<8x8xf32> to vector<8x8xbf16>
    %c1_31 = arith.constant 1 : index
    %c1_32 = arith.constant 1 : index
    %c0_33 = arith.constant 0 : index
    %c0_34 = arith.constant 0 : index
    %64 = vector.load %arg13[%c1_31, %c1_32, %c0_33, %c0_34] : memref<3x4x8x8xbf16, #tpu.memory_space<vmem>>, vector<1x1x8x8xbf16>
    %65 = vector.shape_cast %64 : vector<1x1x8x8xbf16> to vector<8x8xbf16>
    %66 = vector.shape_cast %63 : vector<8x8xbf16> to vector<1x1x8x8xbf16>
    tpu.vector_store %arg13[%c1_31, %c1_32, %c0_33, %c0_34], %66 {strides = array<i32>} : memref<3x4x8x8xbf16, #tpu.memory_space<vmem>>, vector<1x1x8x8xbf16>,
    %67 = vector.extract_strided_slice %37 {offsets = [0, 72], sizes = [8, 8], strides = [1, 1]} : vector<8x96xf32> to vector<8x8xf32>
    %68 = arith.truncf %67 : vector<8x8xf32> to vector<8x8xbf16>
    %c2_35 = arith.constant 2 : index
    %c1_36 = arith.constant 1 : index
    %c0_37 = arith.constant 0 : index
    %c0_38 = arith.constant 0 : index
    %69 = vector.load %arg13[%c2_35, %c1_36, %c0_37, %c0_38] : memref<3x4x8x8xbf16, #tpu.memory_space<vmem>>, vector<1x1x8x8xbf16>
    %70 = vector.shape_cast %69 : vector<1x1x8x8xbf16> to vector<8x8xbf16>
    %71 = vector.shape_cast %68 : vector<8x8xbf16> to vector<1x1x8x8xbf16>
    tpu.vector_store %arg13[%c2_35, %c1_36, %c0_37, %c0_38], %71 {strides = array<i32>} : memref<3x4x8x8xbf16, #tpu.memory_space<vmem>>, vector<1x1x8x8xbf16>,
    %72 = vector.extract_strided_slice %37 {offsets = [0, 16], sizes = [8, 8], strides = [1, 1]} : vector<8x96xf32> to vector<8x8xf32>
    %cst_39 = arith.constant 0.353553385 : f32
    %73 = vector.broadcast %cst_39 : f32 to vector<8x8xf32>
    %74 = arith.mulf %72, %73 : vector<8x8xf32>
    %75 = arith.truncf %74 : vector<8x8xf32> to vector<8x8xbf16>
    %c0_40 = arith.constant 0 : index
    %c2_41 = arith.constant 2 : index
    %c0_42 = arith.constant 0 : index
    %c0_43 = arith.constant 0 : index
    %76 = vector.load %arg13[%c0_40, %c2_41, %c0_42, %c0_43] : memref<3x4x8x8xbf16, #tpu.memory_space<vmem>>, vector<1x1x8x8xbf16>
    %77 = vector.shape_cast %76 : vector<1x1x8x8xbf16> to vector<8x8xbf16>
    %78 = vector.shape_cast %75 : vector<8x8xbf16> to vector<1x1x8x8xbf16>
    tpu.vector_store %arg13[%c0_40, %c2_41, %c0_42, %c0_43], %78 {strides = array<i32>} : memref<3x4x8x8xbf16, #tpu.memory_space<vmem>>, vector<1x1x8x8xbf16>,
    %79 = vector.extract_strided_slice %37 {offsets = [0, 48], sizes = [8, 8], strides = [1, 1]} : vector<8x96xf32> to vector<8x8xf32>
    %80 = arith.truncf %79 : vector<8x8xf32> to vector<8x8xbf16>
    %c1_44 = arith.constant 1 : index
    %c2_45 = arith.constant 2 : index
    %c0_46 = arith.constant 0 : index
    %c0_47 = arith.constant 0 : index
    %81 = vector.load %arg13[%c1_44, %c2_45, %c0_46, %c0_47] : memref<3x4x8x8xbf16, #tpu.memory_space<vmem>>, vector<1x1x8x8xbf16>
    %82 = vector.shape_cast %81 : vector<1x1x8x8xbf16> to vector<8x8xbf16>
    %83 = vector.shape_cast %80 : vector<8x8xbf16> to vector<1x1x8x8xbf16>
    tpu.vector_store %arg13[%c1_44, %c2_45, %c0_46, %c0_47], %83 {strides = array<i32>} : memref<3x4x8x8xbf16, #tpu.memory_space<vmem>>, vector<1x1x8x8xbf16>,
    %84 = vector.extract_strided_slice %37 {offsets = [0, 80], sizes = [8, 8], strides = [1, 1]} : vector<8x96xf32> to vector<8x8xf32>
    %85 = arith.truncf %84 : vector<8x8xf32> to vector<8x8xbf16>
    %c2_48 = arith.constant 2 : index
    %c2_49 = arith.constant 2 : index
    %c0_50 = arith.constant 0 : index
    %c0_51 = arith.constant 0 : index
    %86 = vector.load %arg13[%c2_48, %c2_49, %c0_50, %c0_51] : memref<3x4x8x8xbf16, #tpu.memory_space<vmem>>, vector<1x1x8x8xbf16>
    %87 = vector.shape_cast %86 : vector<1x1x8x8xbf16> to vector<8x8xbf16>
    %88 = vector.shape_cast %85 : vector<8x8xbf16> to vector<1x1x8x8xbf16>
    tpu.vector_store %arg13[%c2_48, %c2_49, %c0_50, %c0_51], %88 {strides = array<i32>} : memref<3x4x8x8xbf16, #tpu.memory_space<vmem>>, vector<1x1x8x8xbf16>,
    %89 = vector.extract_strided_slice %37 {offsets = [0, 24], sizes = [8, 8], strides = [1, 1]} : vector<8x96xf32> to vector<8x8xf32>
    %cst_52 = arith.constant 0.353553385 : f32
    %90 = vector.broadcast %cst_52 : f32 to vector<8x8xf32>
    %91 = arith.mulf %89, %90 : vector<8x8xf32>
    %92 = arith.truncf %91 : vector<8x8xf32> to vector<8x8xbf16>
    %c0_53 = arith.constant 0 : index
    %c3 = arith.constant 3 : index
    %c0_54 = arith.constant 0 : index
    %c0_55 = arith.constant 0 : index
    %93 = vector.load %arg13[%c0_53, %c3, %c0_54, %c0_55] : memref<3x4x8x8xbf16, #tpu.memory_space<vmem>>, vector<1x1x8x8xbf16>
    %94 = vector.shape_cast %93 : vector<1x1x8x8xbf16> to vector<8x8xbf16>
    %95 = vector.shape_cast %92 : vector<8x8xbf16> to vector<1x1x8x8xbf16>
    tpu.vector_store %arg13[%c0_53, %c3, %c0_54, %c0_55], %95 {strides = array<i32>} : memref<3x4x8x8xbf16, #tpu.memory_space<vmem>>, vector<1x1x8x8xbf16>,
    %96 = vector.extract_strided_slice %37 {offsets = [0, 56], sizes = [8, 8], strides = [1, 1]} : vector<8x96xf32> to vector<8x8xf32>
    %97 = arith.truncf %96 : vector<8x8xf32> to vector<8x8xbf16>
    %c1_56 = arith.constant 1 : index
    %c3_57 = arith.constant 3 : index
    %c0_58 = arith.constant 0 : index
    %c0_59 = arith.constant 0 : index
    %98 = vector.load %arg13[%c1_56, %c3_57, %c0_58, %c0_59] : memref<3x4x8x8xbf16, #tpu.memory_space<vmem>>, vector<1x1x8x8xbf16>
    %99 = vector.shape_cast %98 : vector<1x1x8x8xbf16> to vector<8x8xbf16>
    %100 = vector.shape_cast %97 : vector<8x8xbf16> to vector<1x1x8x8xbf16>
    tpu.vector_store %arg13[%c1_56, %c3_57, %c0_58, %c0_59], %100 {strides = array<i32>} : memref<3x4x8x8xbf16, #tpu.memory_space<vmem>>, vector<1x1x8x8xbf16>,
    %101 = vector.extract_strided_slice %37 {offsets = [0, 88], sizes = [8, 8], strides = [1, 1]} : vector<8x96xf32> to vector<8x8xf32>
    %102 = arith.truncf %101 : vector<8x8xf32> to vector<8x8xbf16>
    %c2_60 = arith.constant 2 : index
    %c3_61 = arith.constant 3 : index
    %c0_62 = arith.constant 0 : index
    %c0_63 = arith.constant 0 : index
    %103 = vector.load %arg13[%c2_60, %c3_61, %c0_62, %c0_63] : memref<3x4x8x8xbf16, #tpu.memory_space<vmem>>, vector<1x1x8x8xbf16>
    %104 = vector.shape_cast %103 : vector<1x1x8x8xbf16> to vector<8x8xbf16>
    %105 = vector.shape_cast %102 : vector<8x8xbf16> to vector<1x1x8x8xbf16>
    tpu.vector_store %arg13[%c2_60, %c3_61, %c0_62, %c0_63], %105 {strides = array<i32>} : memref<3x4x8x8xbf16, #tpu.memory_space<vmem>>, vector<1x1x8x8xbf16>,
    %c0_64 = arith.constant 0 : index
    %c0_65 = arith.constant 0 : index
    %c0_66 = arith.constant 0 : index
    %c0_67 = arith.constant 0 : index
    %106 = vector.load %arg13[%c0_64, %c0_65, %c0_66, %c0_67] : memref<3x4x8x8xbf16, #tpu.memory_space<vmem>>, vector<1x4x8x8xbf16>
    %107 = vector.shape_cast %106 : vector<1x4x8x8xbf16> to vector<4x8x8xbf16>
    %c1_68 = arith.constant 1 : index
    %c0_69 = arith.constant 0 : index
    %c0_70 = arith.constant 0 : index
    %c0_71 = arith.constant 0 : index
    %108 = vector.load %arg13[%c1_68, %c0_69, %c0_70, %c0_71] : memref<3x4x8x8xbf16, #tpu.memory_space<vmem>>, vector<1x4x8x8xbf16>
    %109 = vector.shape_cast %108 : vector<1x4x8x8xbf16> to vector<4x8x8xbf16>
    %c2_72 = arith.constant 2 : index
    %c0_73 = arith.constant 0 : index
    %c0_74 = arith.constant 0 : index
    %c0_75 = arith.constant 0 : index
    %110 = vector.load %arg13[%c2_72, %c0_73, %c0_74, %c0_75] : memref<3x4x8x8xbf16, #tpu.memory_space<vmem>>, vector<1x4x8x8xbf16>
    %111 = vector.shape_cast %110 : vector<1x4x8x8xbf16> to vector<4x8x8xbf16>
    "tpu.trace_start"() <{level = 10 : i32, message = "hqd,hkd->hqk"}> : () -> ()
    %cst_76 = arith.constant dense<0.000000e+00> : vector<4x8x8xf32>
    %112 = tpu.matmul %107, %109, %cst_76 {dimension_numbers = #tpu.dot_dimension_numbers<[2], [2], [1], [1], [0, 0, 0, 1, 1, 1], [0], [0]>} : vector<4x8x8xbf16>, vector<4x8x8xbf16>, vector<4x8x8xf32> -> vector<4x8x8xf32>
    "tpu.trace_stop"() : () -> ()
    %cst_77 = arith.constant dense<0xFF800000> : vector<4x8xf32>
    %113 = vector.multi_reduction <maximumf>, %112, %cst_77 [2] : vector<4x8x8xf32> to vector<4x8xf32>
    %114 = vector.shape_cast %113 : vector<4x8xf32> to vector<4x8x1xf32>
    %115 = vector.broadcast %114 : vector<4x8x1xf32> to vector<4x8x8xf32>
    %116 = arith.subf %112, %115 : vector<4x8x8xf32>
    %117 = math.exp %116 : vector<4x8x8xf32>
    %cst_78 = arith.constant dense<0.000000e+00> : vector<4x8xf32>
    %118 = vector.multi_reduction <add>, %117, %cst_78 [2] : vector<4x8x8xf32> to vector<4x8xf32>
    %119 = vector.shape_cast %118 : vector<4x8xf32> to vector<4x8x1xf32>
    %120 = tpu.reciprocal %119 {approx = true} : vector<4x8x1xf32> -> vector<4x8x1xf32>
    %121 = vector.broadcast %120 : vector<4x8x1xf32> to vector<4x8x8xf32>
    %122 = arith.mulf %117, %121 : vector<4x8x8xf32>
    %123 = arith.truncf %122 : vector<4x8x8xf32> to vector<4x8x8xbf16>
    "tpu.trace_start"() <{level = 10 : i32, message = "hqk,hkd->hqd"}> : () -> ()
    %cst_79 = arith.constant dense<0.000000e+00> : vector<4x8x8xf32>
    %124 = tpu.matmul %123, %111, %cst_79 {dimension_numbers = #tpu.dot_dimension_numbers<[2], [1], [1], [2], [0, 0, 0, 1, 1, 2], [0], [0]>} : vector<4x8x8xbf16>, vector<4x8x8xbf16>, vector<4x8x8xf32> -> vector<4x8x8xf32>
    "tpu.trace_stop"() : () -> ()
    %125 = vector.extract_strided_slice %124 {offsets = [0, 0, 0], sizes = [1, 8, 8], strides = [1, 1, 1]} : vector<4x8x8xf32> to vector<1x8x8xf32>
    %126 = vector.shape_cast %125 : vector<1x8x8xf32> to vector<8x8xf32>
    %127 = arith.truncf %126 : vector<8x8xf32> to vector<8x8xbf16>
    %c0_80 = arith.constant 0 : index
    %c0_81 = arith.constant 0 : index
    %128 = vector.load %arg14[%c0_80, %c0_81] : memref<8x32xbf16, #tpu.memory_space<vmem>>, vector<8x8xbf16>
    tpu.vector_store %arg14[%c0_80, %c0_81], %127 {strides = array<i32>} : memref<8x32xbf16, #tpu.memory_space<vmem>>, vector<8x8xbf16>,
    %129 = vector.extract_strided_slice %124 {offsets = [1, 0, 0], sizes = [1, 8, 8], strides = [1, 1, 1]} : vector<4x8x8xf32> to vector<1x8x8xf32>
    %130 = vector.shape_cast %129 : vector<1x8x8xf32> to vector<8x8xf32>
    %131 = arith.truncf %130 : vector<8x8xf32> to vector<8x8xbf16>
    %c0_82 = arith.constant 0 : index
    %c8 = arith.constant 8 : index
    %132 = vector.load %arg14[%c0_82, %c8] : memref<8x32xbf16, #tpu.memory_space<vmem>>, vector<8x8xbf16>
    tpu.vector_store %arg14[%c0_82, %c8], %131 {strides = array<i32>} : memref<8x32xbf16, #tpu.memory_space<vmem>>, vector<8x8xbf16>,
    %133 = vector.extract_strided_slice %124 {offsets = [2, 0, 0], sizes = [1, 8, 8], strides = [1, 1, 1]} : vector<4x8x8xf32> to vector<1x8x8xf32>
    %134 = vector.shape_cast %133 : vector<1x8x8xf32> to vector<8x8xf32>
    %135 = arith.truncf %134 : vector<8x8xf32> to vector<8x8xbf16>
    %c0_83 = arith.constant 0 : index
    %c16 = arith.constant 16 : index
    %136 = vector.load %arg14[%c0_83, %c16] : memref<8x32xbf16, #tpu.memory_space<vmem>>, vector<8x8xbf16>
    tpu.vector_store %arg14[%c0_83, %c16], %135 {strides = array<i32>} : memref<8x32xbf16, #tpu.memory_space<vmem>>, vector<8x8xbf16>,
    %137 = vector.extract_strided_slice %124 {offsets = [3, 0, 0], sizes = [1, 8, 8], strides = [1, 1, 1]} : vector<4x8x8xf32> to vector<1x8x8xf32>
    %138 = vector.shape_cast %137 : vector<1x8x8xf32> to vector<8x8xf32>
    %139 = arith.truncf %138 : vector<8x8xf32> to vector<8x8xbf16>
    %c0_84 = arith.constant 0 : index
    %c24 = arith.constant 24 : index
    %140 = vector.load %arg14[%c0_84, %c24] : memref<8x32xbf16, #tpu.memory_space<vmem>>, vector<8x8xbf16>
    tpu.vector_store %arg14[%c0_84, %c24], %139 {strides = array<i32>} : memref<8x32xbf16, #tpu.memory_space<vmem>>, vector<8x8xbf16>,
    %c0_85 = arith.constant 0 : index
    %c0_86 = arith.constant 0 : index
    %141 = vector.load %arg14[%c0_85, %c0_86] : memref<8x32xbf16, #tpu.memory_space<vmem>>, vector<8x32xbf16>
    %c0_87 = arith.constant 0 : index
    %c0_88 = arith.constant 0 : index
    %142 = vector.load %arg5[%c0_87, %c0_88] : memref<32x32xbf16, #tpu.memory_space<vmem>>, vector<32x32xbf16>
    %cst_89 = arith.constant dense<0.000000e+00> : vector<8x32xf32>
    %143 = tpu.matmul %141, %142, %cst_89 {dimension_numbers = #tpu.dot_dimension_numbers<[1], [0], [0], [1], [0, 0, 1, 1], [], []>} : vector<8x32xbf16>, vector<32x32xbf16>, vector<8x32xf32> -> vector<8x32xf32>
    %c0_90 = arith.constant 0 : index
    %c0_91 = arith.constant 0 : index
    %144 = vector.load %arg6[%c0_90, %c0_91] : memref<1x32xf32, #tpu.memory_space<vmem>>, vector<1x32xf32>
    %145 = vector.shape_cast %144 : vector<1x32xf32> to vector<32xf32>
    %146 = vector.shape_cast %145 : vector<32xf32> to vector<1x32xf32>
    %147 = vector.broadcast %146 : vector<1x32xf32> to vector<8x32xf32>
    %148 = arith.addf %143, %147 : vector<8x32xf32>
    %149 = arith.addf %1, %148 : vector<8x32xf32>
    %c0_92 = arith.constant 0 : index
    %c0_93 = arith.constant 0 : index
    %150 = vector.load %arg7[%c0_92, %c0_93] : memref<2x32xf32, #tpu.memory_space<vmem>>, vector<1x32xf32>
    %151 = vector.shape_cast %150 : vector<1x32xf32> to vector<32xf32>
    %c1_94 = arith.constant 1 : index
    %c0_95 = arith.constant 0 : index
    %152 = vector.load %arg7[%c1_94, %c0_95] : memref<2x32xf32, #tpu.memory_space<vmem>>, vector<1x32xf32>
    %153 = vector.shape_cast %152 : vector<1x32xf32> to vector<32xf32>
    %cst_96 = arith.constant dense<0.000000e+00> : vector<8xf32>
    %154 = vector.multi_reduction <add>, %149, %cst_96 [1] : vector<8x32xf32> to vector<8xf32>
    %155 = vector.shape_cast %154 : vector<8xf32> to vector<8x1xf32>
    %cst_97 = arith.constant 3.200000e+01 : f32
    %156 = vector.broadcast %cst_97 : f32 to vector<8x1xf32>
    %157 = arith.divf %155, %156 : vector<8x1xf32>
    %158 = vector.broadcast %157 : vector<8x1xf32> to vector<8x32xf32>
    %159 = arith.subf %149, %158 : vector<8x32xf32>
    %160 = arith.mulf %159, %159 : vector<8x32xf32>
    %cst_98 = arith.constant dense<0.000000e+00> : vector<8xf32>
    %161 = vector.multi_reduction <add>, %160, %cst_98 [1] : vector<8x32xf32> to vector<8xf32>
    %162 = vector.shape_cast %161 : vector<8xf32> to vector<8x1xf32>
    %cst_99 = arith.constant 3.200000e+01 : f32
    %163 = vector.broadcast %cst_99 : f32 to vector<8x1xf32>
    %164 = arith.divf %162, %163 : vector<8x1xf32>
    %165 = vector.broadcast %157 : vector<8x1xf32> to vector<8x32xf32>
    %166 = arith.subf %149, %165 : vector<8x32xf32>
    %cst_100 = arith.constant 9.99999974E-6 : f32
    %167 = vector.broadcast %cst_100 : f32 to vector<8x1xf32>
    %168 = arith.addf %164, %167 : vector<8x1xf32>
    %169 = math.rsqrt %168 : vector<8x1xf32>
    %170 = vector.broadcast %169 : vector<8x1xf32> to vector<8x32xf32>
    %171 = arith.mulf %166, %170 : vector<8x32xf32>
    %172 = vector.shape_cast %151 : vector<32xf32> to vector<1x32xf32>
    %173 = vector.broadcast %172 : vector<1x32xf32> to vector<8x32xf32>
    %174 = arith.mulf %171, %173 : vector<8x32xf32>
    %175 = vector.shape_cast %153 : vector<32xf32> to vector<1x32xf32>
    %176 = vector.broadcast %175 : vector<1x32xf32> to vector<8x32xf32>
    %177 = arith.addf %174, %176 : vector<8x32xf32>
    %178 = arith.truncf %177 : vector<8x32xf32> to vector<8x32xbf16>
    %c0_101 = arith.constant 0 : index
    %c0_102 = arith.constant 0 : index
    %179 = vector.load %arg8[%c0_101, %c0_102] : memref<32x128xbf16, #tpu.memory_space<vmem>>, vector<32x128xbf16>
    %cst_103 = arith.constant dense<0.000000e+00> : vector<8x128xf32>
    %180 = tpu.matmul %178, %179, %cst_103 {dimension_numbers = #tpu.dot_dimension_numbers<[1], [0], [0], [1], [0, 0, 1, 1], [], []>} : vector<8x32xbf16>, vector<32x128xbf16>, vector<8x128xf32> -> vector<8x128xf32>
    %c0_104 = arith.constant 0 : index
    %c0_105 = arith.constant 0 : index
    %181 = vector.load %arg9[%c0_104, %c0_105] : memref<1x128xf32, #tpu.memory_space<vmem>>, vector<1x128xf32>
    %182 = vector.shape_cast %181 : vector<1x128xf32> to vector<128xf32>
    %183 = vector.shape_cast %182 : vector<128xf32> to vector<1x128xf32>
    %184 = vector.broadcast %183 : vector<1x128xf32> to vector<8x128xf32>
    %185 = arith.addf %180, %184 : vector<8x128xf32>
    %cst_106 = arith.constant 1.702000e+00 : f32
    %186 = vector.broadcast %cst_106 : f32 to vector<8x128xf32>
    %187 = arith.mulf %186, %185 : vector<8x128xf32>
    %188 = arith.negf %187 : vector<8x128xf32>
    %189 = math.exp %188 : vector<8x128xf32>
    %cst_107 = arith.constant 1.000000e+00 : f32
    %190 = vector.broadcast %cst_107 : f32 to vector<8x128xf32>
    %191 = arith.addf %190, %189 : vector<8x128xf32>
    %192 = arith.divf %190, %191 : vector<8x128xf32>
    %193 = arith.mulf %185, %192 : vector<8x128xf32>
    %194 = arith.truncf %193 : vector<8x128xf32> to vector<8x128xbf16>
    %c0_108 = arith.constant 0 : index
    %c0_109 = arith.constant 0 : index
    %195 = vector.load %arg10[%c0_108, %c0_109] : memref<128x32xbf16, #tpu.memory_space<vmem>>, vector<128x32xbf16>
    %cst_110 = arith.constant dense<0.000000e+00> : vector<8x32xf32>
    %196 = tpu.matmul %194, %195, %cst_110 {dimension_numbers = #tpu.dot_dimension_numbers<[1], [0], [0], [1], [0, 0, 1, 1], [], []>} : vector<8x128xbf16>, vector<128x32xbf16>, vector<8x32xf32> -> vector<8x32xf32>
    %c0_111 = arith.constant 0 : index
    %c0_112 = arith.constant 0 : index
    %197 = vector.load %arg11[%c0_111, %c0_112] : memref<1x32xf32, #tpu.memory_space<vmem>>, vector<1x32xf32>
    %198 = vector.shape_cast %197 : vector<1x32xf32> to vector<32xf32>
    %199 = vector.shape_cast %198 : vector<32xf32> to vector<1x32xf32>
    %200 = vector.broadcast %199 : vector<1x32xf32> to vector<8x32xf32>
    %201 = arith.addf %196, %200 : vector<8x32xf32>
    %202 = arith.addf %149, %201 : vector<8x32xf32>
    %c0_113 = arith.constant 0 : index
    %c0_114 = arith.constant 0 : index
    %c0_115 = arith.constant 0 : index
    %203 = vector.load %arg12[%c0_113, %c0_114, %c0_115] : memref<1x8x32xf32, #tpu.memory_space<vmem>>, vector<1x8x32xf32>
    %204 = vector.shape_cast %203 : vector<1x8x32xf32> to vector<8x32xf32>
    %205 = vector.shape_cast %202 : vector<8x32xf32> to vector<1x8x32xf32>
    tpu.vector_store %arg12[%c0_113, %c0_114, %c0_115], %205 {strides = array<i32>} : memref<1x8x32xf32, #tpu.memory_space<vmem>>, vector<1x8x32xf32>,
    return
  }
  func.func @transform_0(%arg0: i32) -> (i32, i32, i32) {
    %c0_i32 = arith.constant 0 : i32
    %c0_i32_0 = arith.constant 0 : i32
    %c0_i32_1 = arith.constant 0 : i32
    return %arg0, %c0_i32, %c0_i32_0 : i32, i32, i32
  }
  func.func @transform_1(%arg0: i32) -> (i32, i32) {
    %c0_i32 = arith.constant 0 : i32
    %c0_i32_0 = arith.constant 0 : i32
    %c0_i32_1 = arith.constant 0 : i32
    return %c0_i32, %c0_i32_0 : i32, i32
  }
  func.func @transform_2(%arg0: i32) -> (i32, i32) {
    %c0_i32 = arith.constant 0 : i32
    %c0_i32_0 = arith.constant 0 : i32
    %c0_i32_1 = arith.constant 0 : i32
    return %c0_i32, %c0_i32_0 : i32, i32
  }
  func.func @transform_3(%arg0: i32) -> (i32, i32) {
    %c0_i32 = arith.constant 0 : i32
    %c0_i32_0 = arith.constant 0 : i32
    %c0_i32_1 = arith.constant 0 : i32
    return %c0_i32, %c0_i32_0 : i32, i32
  }
  func.func @transform_4(%arg0: i32) -> (i32, i32) {
    %c0_i32 = arith.constant 0 : i32
    %c0_i32_0 = arith.constant 0 : i32
    %c0_i32_1 = arith.constant 0 : i32
    return %c0_i32, %c0_i32_0 : i32, i32
  }
  func.func @transform_5(%arg0: i32) -> (i32, i32) {
    %c0_i32 = arith.constant 0 : i32
    %c0_i32_0 = arith.constant 0 : i32
    %c0_i32_1 = arith.constant 0 : i32
    return %c0_i32, %c0_i32_0 : i32, i32
  }
  func.func @transform_6(%arg0: i32) -> (i32, i32) {
    %c0_i32 = arith.constant 0 : i32
    %c0_i32_0 = arith.constant 0 : i32
    %c0_i32_1 = arith.constant 0 : i32
    return %c0_i32, %c0_i32_0 : i32, i32
  }
  func.func @transform_7(%arg0: i32) -> (i32, i32) {
    %c0_i32 = arith.constant 0 : i32
    %c0_i32_0 = arith.constant 0 : i32
    %c0_i32_1 = arith.constant 0 : i32
    return %c0_i32, %c0_i32_0 : i32, i32
  }
  func.func @transform_8(%arg0: i32) -> (i32, i32) {
    %c0_i32 = arith.constant 0 : i32
    %c0_i32_0 = arith.constant 0 : i32
    %c0_i32_1 = arith.constant 0 : i32
    return %c0_i32, %c0_i32_0 : i32, i32
  }
  func.func @transform_9(%arg0: i32) -> (i32, i32) {
    %c0_i32 = arith.constant 0 : i32
    %c0_i32_0 = arith.constant 0 : i32
    %c0_i32_1 = arith.constant 0 : i32
    return %c0_i32, %c0_i32_0 : i32, i32
  }
  func.func @transform_10(%arg0: i32) -> (i32, i32) {
    %c0_i32 = arith.constant 0 : i32
    %c0_i32_0 = arith.constant 0 : i32
    %c0_i32_1 = arith.constant 0 : i32
    return %c0_i32, %c0_i32_0 : i32, i32
  }
  func.func @transform_11(%arg0: i32) -> (i32, i32, i32) {
    %c0_i32 = arith.constant 0 : i32
    %c0_i32_0 = arith.constant 0 : i32
    %c0_i32_1 = arith.constant 0 : i32
    return %arg0, %c0_i32, %c0_i32_0 : i32, i32, i32
  }
}

module attributes {stable_mosaic.version = 11 : i64} {
  func.func @residual_attention_block_kernel(%arg0: i32, %arg1: memref<1x8x32xf32, #tpu.memory_space<vmem>>, %arg2: memref<2x32xf32, #tpu.memory_space<vmem>>, %arg3: memref<32x96xbf16, #tpu.memory_space<vmem>>, %arg4: memref<1x96xf32, #tpu.memory_space<vmem>>, %arg5: memref<32x32xbf16, #tpu.memory_space<vmem>>, %arg6: memref<1x32xf32, #tpu.memory_space<vmem>>, %arg7: memref<2x32xf32, #tpu.memory_space<vmem>>, %arg8: memref<32x128xbf16, #tpu.memory_space<vmem>>, %arg9: memref<1x128xf32, #tpu.memory_space<vmem>>, %arg10: memref<128x32xbf16, #tpu.memory_space<vmem>>, %arg11: memref<1x32xf32, #tpu.memory_space<vmem>>, %arg12: memref<1x8x32xf32, #tpu.memory_space<vmem>>, %arg13: memref<1x8x8xf32, #tpu.memory_space<vmem>>, %arg14: memref<3x4x8x8xbf16, #tpu.memory_space<vmem>>, %arg15: memref<8x32xbf16, #tpu.memory_space<vmem>>) attributes {dimension_semantics = [#tpu.dimension_semantics<parallel>], iteration_bounds = array<i64: 2>, scalar_prefetch = 0 : i64, scratch_operands = 2 : i64, tpu.core_type = #tpu.core_type<tc>, window_params = [{transform_indices = @transform_0, window_bounds = array<i64: 1, 8, 32>}, {pipeline_mode = #tpu.pipeline_mode<synchronous>, transform_indices = @transform_1, window_bounds = array<i64: 2, 32>}, {pipeline_mode = #tpu.pipeline_mode<synchronous>, transform_indices = @transform_2, window_bounds = array<i64: 32, 96>}, {pipeline_mode = #tpu.pipeline_mode<synchronous>, transform_indices = @transform_3, window_bounds = array<i64: 1, 96>}, {pipeline_mode = #tpu.pipeline_mode<synchronous>, transform_indices = @transform_4, window_bounds = array<i64: 32, 32>}, {pipeline_mode = #tpu.pipeline_mode<synchronous>, transform_indices = @transform_5, window_bounds = array<i64: 1, 32>}, {pipeline_mode = #tpu.pipeline_mode<synchronous>, transform_indices = @transform_6, window_bounds = array<i64: 2, 32>}, {pipeline_mode = #tpu.pipeline_mode<synchronous>, transform_indices = @transform_7, window_bounds = array<i64: 32, 128>}, {pipeline_mode = #tpu.pipeline_mode<synchronous>, transform_indices = @transform_8, window_bounds = array<i64: 1, 128>}, {pipeline_mode = #tpu.pipeline_mode<synchronous>, transform_indices = @transform_9, window_bounds = array<i64: 128, 32>}, {pipeline_mode = #tpu.pipeline_mode<synchronous>, transform_indices = @transform_10, window_bounds = array<i64: 1, 32>}, {transform_indices = @transform_11, window_bounds = array<i64: 1, 8, 32>}, {transform_indices = @transform_12, window_bounds = array<i64: 1, 8, 8>}]} {
    %c0 = arith.constant 0 : index
    %c0_0 = arith.constant 0 : index
    %c0_1 = arith.constant 0 : index
    %0 = vector.load %arg1[%c0, %c0_0, %c0_1] : memref<1x8x32xf32, #tpu.memory_space<vmem>>, vector<1x8x32xf32>
    %1 = vector.shape_cast %0 : vector<1x8x32xf32> to vector<8x32xf32>
    %c0_2 = arith.constant 0 : index
    %c0_3 = arith.constant 0 : index
    %2 = vector.load %arg2[%c0_2, %c0_3] : memref<2x32xf32, #tpu.memory_space<vmem>>, vector<1x32xf32>
    %3 = vector.shape_cast %2 : vector<1x32xf32> to vector<32xf32>
    %c1 = arith.constant 1 : index
    %c0_4 = arith.constant 0 : index
    %4 = vector.load %arg2[%c1, %c0_4] : memref<2x32xf32, #tpu.memory_space<vmem>>, vector<1x32xf32>
    %5 = vector.shape_cast %4 : vector<1x32xf32> to vector<32xf32>
    %cst = arith.constant dense<0.000000e+00> : vector<8xf32>
    %6 = vector.multi_reduction <add>, %1, %cst [1] : vector<8x32xf32> to vector<8xf32>
    %7 = vector.shape_cast %6 : vector<8xf32> to vector<8x1xf32>
    %cst_5 = arith.constant 3.200000e+01 : f32
    %8 = vector.broadcast %cst_5 : f32 to vector<8x1xf32>
    %9 = arith.divf %7, %8 : vector<8x1xf32>
    %10 = vector.broadcast %9 : vector<8x1xf32> to vector<8x32xf32>
    %11 = arith.subf %1, %10 : vector<8x32xf32>
    %12 = arith.mulf %11, %11 : vector<8x32xf32>
    %cst_6 = arith.constant dense<0.000000e+00> : vector<8xf32>
    %13 = vector.multi_reduction <add>, %12, %cst_6 [1] : vector<8x32xf32> to vector<8xf32>
    %14 = vector.shape_cast %13 : vector<8xf32> to vector<8x1xf32>
    %cst_7 = arith.constant 3.200000e+01 : f32
    %15 = vector.broadcast %cst_7 : f32 to vector<8x1xf32>
    %16 = arith.divf %14, %15 : vector<8x1xf32>
    %17 = vector.broadcast %9 : vector<8x1xf32> to vector<8x32xf32>
    %18 = arith.subf %1, %17 : vector<8x32xf32>
    %cst_8 = arith.constant 9.99999974E-6 : f32
    %19 = vector.broadcast %cst_8 : f32 to vector<8x1xf32>
    %20 = arith.addf %16, %19 : vector<8x1xf32>
    %21 = math.rsqrt %20 : vector<8x1xf32>
    %22 = vector.broadcast %21 : vector<8x1xf32> to vector<8x32xf32>
    %23 = arith.mulf %18, %22 : vector<8x32xf32>
    %24 = vector.shape_cast %3 : vector<32xf32> to vector<1x32xf32>
    %25 = vector.broadcast %24 : vector<1x32xf32> to vector<8x32xf32>
    %26 = arith.mulf %23, %25 : vector<8x32xf32>
    %27 = vector.shape_cast %5 : vector<32xf32> to vector<1x32xf32>
    %28 = vector.broadcast %27 : vector<1x32xf32> to vector<8x32xf32>
    %29 = arith.addf %26, %28 : vector<8x32xf32>
    %30 = arith.truncf %29 : vector<8x32xf32> to vector<8x32xbf16>
    %c0_9 = arith.constant 0 : index
    %c0_10 = arith.constant 0 : index
    %31 = vector.load %arg3[%c0_9, %c0_10] : memref<32x96xbf16, #tpu.memory_space<vmem>>, vector<32x96xbf16>
    %cst_11 = arith.constant dense<0.000000e+00> : vector<8x96xf32>
    %32 = tpu.matmul %30, %31, %cst_11 {dimension_numbers = #tpu.dot_dimension_numbers<[1], [0], [0], [1], [0, 0, 1, 1], [], []>} : vector<8x32xbf16>, vector<32x96xbf16>, vector<8x96xf32> -> vector<8x96xf32>
    %c0_12 = arith.constant 0 : index
    %c0_13 = arith.constant 0 : index
    %33 = vector.load %arg4[%c0_12, %c0_13] : memref<1x96xf32, #tpu.memory_space<vmem>>, vector<1x96xf32>
    %34 = vector.shape_cast %33 : vector<1x96xf32> to vector<96xf32>
    %35 = vector.shape_cast %34 : vector<96xf32> to vector<1x96xf32>
    %36 = vector.broadcast %35 : vector<1x96xf32> to vector<8x96xf32>
    %37 = arith.addf %32, %36 : vector<8x96xf32>
    %38 = vector.extract_strided_slice %37 {offsets = [0, 0], sizes = [8, 8], strides = [1, 1]} : vector<8x96xf32> to vector<8x8xf32>
    %cst_14 = arith.constant 0.353553385 : f32
    %39 = vector.broadcast %cst_14 : f32 to vector<8x8xf32>
    %40 = arith.mulf %38, %39 : vector<8x8xf32>
    %41 = arith.truncf %40 : vector<8x8xf32> to vector<8x8xbf16>
    %c0_15 = arith.constant 0 : index
    %c0_16 = arith.constant 0 : index
    %c0_17 = arith.constant 0 : index
    %c0_18 = arith.constant 0 : index
    %42 = vector.load %arg14[%c0_15, %c0_16, %c0_17, %c0_18] : memref<3x4x8x8xbf16, #tpu.memory_space<vmem>>, vector<1x1x8x8xbf16>
    %43 = vector.shape_cast %42 : vector<1x1x8x8xbf16> to vector<8x8xbf16>
    %44 = vector.shape_cast %41 : vector<8x8xbf16> to vector<1x1x8x8xbf16>
    tpu.vector_store %arg14[%c0_15, %c0_16, %c0_17, %c0_18], %44 {strides = array<i32>} : memref<3x4x8x8xbf16, #tpu.memory_space<vmem>>, vector<1x1x8x8xbf16>,
    %45 = vector.extract_strided_slice %37 {offsets = [0, 32], sizes = [8, 8], strides = [1, 1]} : vector<8x96xf32> to vector<8x8xf32>
    %46 = arith.truncf %45 : vector<8x8xf32> to vector<8x8xbf16>
    %c1_19 = arith.constant 1 : index
    %c0_20 = arith.constant 0 : index
    %c0_21 = arith.constant 0 : index
    %c0_22 = arith.constant 0 : index
    %47 = vector.load %arg14[%c1_19, %c0_20, %c0_21, %c0_22] : memref<3x4x8x8xbf16, #tpu.memory_space<vmem>>, vector<1x1x8x8xbf16>
    %48 = vector.shape_cast %47 : vector<1x1x8x8xbf16> to vector<8x8xbf16>
    %49 = vector.shape_cast %46 : vector<8x8xbf16> to vector<1x1x8x8xbf16>
    tpu.vector_store %arg14[%c1_19, %c0_20, %c0_21, %c0_22], %49 {strides = array<i32>} : memref<3x4x8x8xbf16, #tpu.memory_space<vmem>>, vector<1x1x8x8xbf16>,
    %50 = vector.extract_strided_slice %37 {offsets = [0, 64], sizes = [8, 8], strides = [1, 1]} : vector<8x96xf32> to vector<8x8xf32>
    %51 = arith.truncf %50 : vector<8x8xf32> to vector<8x8xbf16>
    %c2 = arith.constant 2 : index
    %c0_23 = arith.constant 0 : index
    %c0_24 = arith.constant 0 : index
    %c0_25 = arith.constant 0 : index
    %52 = vector.load %arg14[%c2, %c0_23, %c0_24, %c0_25] : memref<3x4x8x8xbf16, #tpu.memory_space<vmem>>, vector<1x1x8x8xbf16>
    %53 = vector.shape_cast %52 : vector<1x1x8x8xbf16> to vector<8x8xbf16>
    %54 = vector.shape_cast %51 : vector<8x8xbf16> to vector<1x1x8x8xbf16>
    tpu.vector_store %arg14[%c2, %c0_23, %c0_24, %c0_25], %54 {strides = array<i32>} : memref<3x4x8x8xbf16, #tpu.memory_space<vmem>>, vector<1x1x8x8xbf16>,
    %55 = vector.extract_strided_slice %37 {offsets = [0, 8], sizes = [8, 8], strides = [1, 1]} : vector<8x96xf32> to vector<8x8xf32>
    %cst_26 = arith.constant 0.353553385 : f32
    %56 = vector.broadcast %cst_26 : f32 to vector<8x8xf32>
    %57 = arith.mulf %55, %56 : vector<8x8xf32>
    %58 = arith.truncf %57 : vector<8x8xf32> to vector<8x8xbf16>
    %c0_27 = arith.constant 0 : index
    %c1_28 = arith.constant 1 : index
    %c0_29 = arith.constant 0 : index
    %c0_30 = arith.constant 0 : index
    %59 = vector.load %arg14[%c0_27, %c1_28, %c0_29, %c0_30] : memref<3x4x8x8xbf16, #tpu.memory_space<vmem>>, vector<1x1x8x8xbf16>
    %60 = vector.shape_cast %59 : vector<1x1x8x8xbf16> to vector<8x8xbf16>
    %61 = vector.shape_cast %58 : vector<8x8xbf16> to vector<1x1x8x8xbf16>
    tpu.vector_store %arg14[%c0_27, %c1_28, %c0_29, %c0_30], %61 {strides = array<i32>} : memref<3x4x8x8xbf16, #tpu.memory_space<vmem>>, vector<1x1x8x8xbf16>,
    %62 = vector.extract_strided_slice %37 {offsets = [0, 40], sizes = [8, 8], strides = [1, 1]} : vector<8x96xf32> to vector<8x8xf32>
    %63 = arith.truncf %62 : vector<8x8xf32> to vector<8x8xbf16>
    %c1_31 = arith.constant 1 : index
    %c1_32 = arith.constant 1 : index
    %c0_33 = arith.constant 0 : index
    %c0_34 = arith.constant 0 : index
    %64 = vector.load %arg14[%c1_31, %c1_32, %c0_33, %c0_34] : memref<3x4x8x8xbf16, #tpu.memory_space<vmem>>, vector<1x1x8x8xbf16>
    %65 = vector.shape_cast %64 : vector<1x1x8x8xbf16> to vector<8x8xbf16>
    %66 = vector.shape_cast %63 : vector<8x8xbf16> to vector<1x1x8x8xbf16>
    tpu.vector_store %arg14[%c1_31, %c1_32, %c0_33, %c0_34], %66 {strides = array<i32>} : memref<3x4x8x8xbf16, #tpu.memory_space<vmem>>, vector<1x1x8x8xbf16>,
    %67 = vector.extract_strided_slice %37 {offsets = [0, 72], sizes = [8, 8], strides = [1, 1]} : vector<8x96xf32> to vector<8x8xf32>
    %68 = arith.truncf %67 : vector<8x8xf32> to vector<8x8xbf16>
    %c2_35 = arith.constant 2 : index
    %c1_36 = arith.constant 1 : index
    %c0_37 = arith.constant 0 : index
    %c0_38 = arith.constant 0 : index
    %69 = vector.load %arg14[%c2_35, %c1_36, %c0_37, %c0_38] : memref<3x4x8x8xbf16, #tpu.memory_space<vmem>>, vector<1x1x8x8xbf16>
    %70 = vector.shape_cast %69 : vector<1x1x8x8xbf16> to vector<8x8xbf16>
    %71 = vector.shape_cast %68 : vector<8x8xbf16> to vector<1x1x8x8xbf16>
    tpu.vector_store %arg14[%c2_35, %c1_36, %c0_37, %c0_38], %71 {strides = array<i32>} : memref<3x4x8x8xbf16, #tpu.memory_space<vmem>>, vector<1x1x8x8xbf16>,
    %72 = vector.extract_strided_slice %37 {offsets = [0, 16], sizes = [8, 8], strides = [1, 1]} : vector<8x96xf32> to vector<8x8xf32>
    %cst_39 = arith.constant 0.353553385 : f32
    %73 = vector.broadcast %cst_39 : f32 to vector<8x8xf32>
    %74 = arith.mulf %72, %73 : vector<8x8xf32>
    %75 = arith.truncf %74 : vector<8x8xf32> to vector<8x8xbf16>
    %c0_40 = arith.constant 0 : index
    %c2_41 = arith.constant 2 : index
    %c0_42 = arith.constant 0 : index
    %c0_43 = arith.constant 0 : index
    %76 = vector.load %arg14[%c0_40, %c2_41, %c0_42, %c0_43] : memref<3x4x8x8xbf16, #tpu.memory_space<vmem>>, vector<1x1x8x8xbf16>
    %77 = vector.shape_cast %76 : vector<1x1x8x8xbf16> to vector<8x8xbf16>
    %78 = vector.shape_cast %75 : vector<8x8xbf16> to vector<1x1x8x8xbf16>
    tpu.vector_store %arg14[%c0_40, %c2_41, %c0_42, %c0_43], %78 {strides = array<i32>} : memref<3x4x8x8xbf16, #tpu.memory_space<vmem>>, vector<1x1x8x8xbf16>,
    %79 = vector.extract_strided_slice %37 {offsets = [0, 48], sizes = [8, 8], strides = [1, 1]} : vector<8x96xf32> to vector<8x8xf32>
    %80 = arith.truncf %79 : vector<8x8xf32> to vector<8x8xbf16>
    %c1_44 = arith.constant 1 : index
    %c2_45 = arith.constant 2 : index
    %c0_46 = arith.constant 0 : index
    %c0_47 = arith.constant 0 : index
    %81 = vector.load %arg14[%c1_44, %c2_45, %c0_46, %c0_47] : memref<3x4x8x8xbf16, #tpu.memory_space<vmem>>, vector<1x1x8x8xbf16>
    %82 = vector.shape_cast %81 : vector<1x1x8x8xbf16> to vector<8x8xbf16>
    %83 = vector.shape_cast %80 : vector<8x8xbf16> to vector<1x1x8x8xbf16>
    tpu.vector_store %arg14[%c1_44, %c2_45, %c0_46, %c0_47], %83 {strides = array<i32>} : memref<3x4x8x8xbf16, #tpu.memory_space<vmem>>, vector<1x1x8x8xbf16>,
    %84 = vector.extract_strided_slice %37 {offsets = [0, 80], sizes = [8, 8], strides = [1, 1]} : vector<8x96xf32> to vector<8x8xf32>
    %85 = arith.truncf %84 : vector<8x8xf32> to vector<8x8xbf16>
    %c2_48 = arith.constant 2 : index
    %c2_49 = arith.constant 2 : index
    %c0_50 = arith.constant 0 : index
    %c0_51 = arith.constant 0 : index
    %86 = vector.load %arg14[%c2_48, %c2_49, %c0_50, %c0_51] : memref<3x4x8x8xbf16, #tpu.memory_space<vmem>>, vector<1x1x8x8xbf16>
    %87 = vector.shape_cast %86 : vector<1x1x8x8xbf16> to vector<8x8xbf16>
    %88 = vector.shape_cast %85 : vector<8x8xbf16> to vector<1x1x8x8xbf16>
    tpu.vector_store %arg14[%c2_48, %c2_49, %c0_50, %c0_51], %88 {strides = array<i32>} : memref<3x4x8x8xbf16, #tpu.memory_space<vmem>>, vector<1x1x8x8xbf16>,
    %89 = vector.extract_strided_slice %37 {offsets = [0, 24], sizes = [8, 8], strides = [1, 1]} : vector<8x96xf32> to vector<8x8xf32>
    %cst_52 = arith.constant 0.353553385 : f32
    %90 = vector.broadcast %cst_52 : f32 to vector<8x8xf32>
    %91 = arith.mulf %89, %90 : vector<8x8xf32>
    %92 = arith.truncf %91 : vector<8x8xf32> to vector<8x8xbf16>
    %c0_53 = arith.constant 0 : index
    %c3 = arith.constant 3 : index
    %c0_54 = arith.constant 0 : index
    %c0_55 = arith.constant 0 : index
    %93 = vector.load %arg14[%c0_53, %c3, %c0_54, %c0_55] : memref<3x4x8x8xbf16, #tpu.memory_space<vmem>>, vector<1x1x8x8xbf16>
    %94 = vector.shape_cast %93 : vector<1x1x8x8xbf16> to vector<8x8xbf16>
    %95 = vector.shape_cast %92 : vector<8x8xbf16> to vector<1x1x8x8xbf16>
    tpu.vector_store %arg14[%c0_53, %c3, %c0_54, %c0_55], %95 {strides = array<i32>} : memref<3x4x8x8xbf16, #tpu.memory_space<vmem>>, vector<1x1x8x8xbf16>,
    %96 = vector.extract_strided_slice %37 {offsets = [0, 56], sizes = [8, 8], strides = [1, 1]} : vector<8x96xf32> to vector<8x8xf32>
    %97 = arith.truncf %96 : vector<8x8xf32> to vector<8x8xbf16>
    %c1_56 = arith.constant 1 : index
    %c3_57 = arith.constant 3 : index
    %c0_58 = arith.constant 0 : index
    %c0_59 = arith.constant 0 : index
    %98 = vector.load %arg14[%c1_56, %c3_57, %c0_58, %c0_59] : memref<3x4x8x8xbf16, #tpu.memory_space<vmem>>, vector<1x1x8x8xbf16>
    %99 = vector.shape_cast %98 : vector<1x1x8x8xbf16> to vector<8x8xbf16>
    %100 = vector.shape_cast %97 : vector<8x8xbf16> to vector<1x1x8x8xbf16>
    tpu.vector_store %arg14[%c1_56, %c3_57, %c0_58, %c0_59], %100 {strides = array<i32>} : memref<3x4x8x8xbf16, #tpu.memory_space<vmem>>, vector<1x1x8x8xbf16>,
    %101 = vector.extract_strided_slice %37 {offsets = [0, 88], sizes = [8, 8], strides = [1, 1]} : vector<8x96xf32> to vector<8x8xf32>
    %102 = arith.truncf %101 : vector<8x8xf32> to vector<8x8xbf16>
    %c2_60 = arith.constant 2 : index
    %c3_61 = arith.constant 3 : index
    %c0_62 = arith.constant 0 : index
    %c0_63 = arith.constant 0 : index
    %103 = vector.load %arg14[%c2_60, %c3_61, %c0_62, %c0_63] : memref<3x4x8x8xbf16, #tpu.memory_space<vmem>>, vector<1x1x8x8xbf16>
    %104 = vector.shape_cast %103 : vector<1x1x8x8xbf16> to vector<8x8xbf16>
    %105 = vector.shape_cast %102 : vector<8x8xbf16> to vector<1x1x8x8xbf16>
    tpu.vector_store %arg14[%c2_60, %c3_61, %c0_62, %c0_63], %105 {strides = array<i32>} : memref<3x4x8x8xbf16, #tpu.memory_space<vmem>>, vector<1x1x8x8xbf16>,
    %c0_64 = arith.constant 0 : index
    %c0_65 = arith.constant 0 : index
    %c0_66 = arith.constant 0 : index
    %c0_67 = arith.constant 0 : index
    %106 = vector.load %arg14[%c0_64, %c0_65, %c0_66, %c0_67] : memref<3x4x8x8xbf16, #tpu.memory_space<vmem>>, vector<1x4x8x8xbf16>
    %107 = vector.shape_cast %106 : vector<1x4x8x8xbf16> to vector<4x8x8xbf16>
    %c1_68 = arith.constant 1 : index
    %c0_69 = arith.constant 0 : index
    %c0_70 = arith.constant 0 : index
    %c0_71 = arith.constant 0 : index
    %108 = vector.load %arg14[%c1_68, %c0_69, %c0_70, %c0_71] : memref<3x4x8x8xbf16, #tpu.memory_space<vmem>>, vector<1x4x8x8xbf16>
    %109 = vector.shape_cast %108 : vector<1x4x8x8xbf16> to vector<4x8x8xbf16>
    %c2_72 = arith.constant 2 : index
    %c0_73 = arith.constant 0 : index
    %c0_74 = arith.constant 0 : index
    %c0_75 = arith.constant 0 : index
    %110 = vector.load %arg14[%c2_72, %c0_73, %c0_74, %c0_75] : memref<3x4x8x8xbf16, #tpu.memory_space<vmem>>, vector<1x4x8x8xbf16>
    %111 = vector.shape_cast %110 : vector<1x4x8x8xbf16> to vector<4x8x8xbf16>
    "tpu.trace_start"() <{level = 10 : i32, message = "hqd,hkd->hqk"}> : () -> ()
    %cst_76 = arith.constant dense<0.000000e+00> : vector<4x8x8xf32>
    %112 = tpu.matmul %107, %109, %cst_76 {dimension_numbers = #tpu.dot_dimension_numbers<[2], [2], [1], [1], [0, 0, 0, 1, 1, 1], [0], [0]>} : vector<4x8x8xbf16>, vector<4x8x8xbf16>, vector<4x8x8xf32> -> vector<4x8x8xf32>
    "tpu.trace_stop"() : () -> ()
    %cst_77 = arith.constant dense<0xFF800000> : vector<4x8xf32>
    %113 = vector.multi_reduction <maximumf>, %112, %cst_77 [2] : vector<4x8x8xf32> to vector<4x8xf32>
    %114 = vector.shape_cast %113 : vector<4x8xf32> to vector<4x8x1xf32>
    %115 = vector.broadcast %114 : vector<4x8x1xf32> to vector<4x8x8xf32>
    %116 = arith.subf %112, %115 : vector<4x8x8xf32>
    %117 = math.exp %116 : vector<4x8x8xf32>
    %cst_78 = arith.constant dense<0.000000e+00> : vector<4x8xf32>
    %118 = vector.multi_reduction <add>, %117, %cst_78 [2] : vector<4x8x8xf32> to vector<4x8xf32>
    %119 = vector.shape_cast %118 : vector<4x8xf32> to vector<4x8x1xf32>
    %120 = tpu.reciprocal %119 {approx = true} : vector<4x8x1xf32> -> vector<4x8x1xf32>
    %121 = vector.broadcast %120 : vector<4x8x1xf32> to vector<4x8x8xf32>
    %122 = arith.mulf %117, %121 : vector<4x8x8xf32>
    %123 = arith.truncf %122 : vector<4x8x8xf32> to vector<4x8x8xbf16>
    "tpu.trace_start"() <{level = 10 : i32, message = "hqk,hkd->hqd"}> : () -> ()
    %cst_79 = arith.constant dense<0.000000e+00> : vector<4x8x8xf32>
    %124 = tpu.matmul %123, %111, %cst_79 {dimension_numbers = #tpu.dot_dimension_numbers<[2], [1], [1], [2], [0, 0, 0, 1, 1, 2], [0], [0]>} : vector<4x8x8xbf16>, vector<4x8x8xbf16>, vector<4x8x8xf32> -> vector<4x8x8xf32>
    "tpu.trace_stop"() : () -> ()
    %125 = vector.extract_strided_slice %124 {offsets = [0, 0, 0], sizes = [1, 8, 8], strides = [1, 1, 1]} : vector<4x8x8xf32> to vector<1x8x8xf32>
    %126 = vector.shape_cast %125 : vector<1x8x8xf32> to vector<8x8xf32>
    %127 = arith.truncf %126 : vector<8x8xf32> to vector<8x8xbf16>
    %c0_80 = arith.constant 0 : index
    %c0_81 = arith.constant 0 : index
    %128 = vector.load %arg15[%c0_80, %c0_81] : memref<8x32xbf16, #tpu.memory_space<vmem>>, vector<8x8xbf16>
    tpu.vector_store %arg15[%c0_80, %c0_81], %127 {strides = array<i32>} : memref<8x32xbf16, #tpu.memory_space<vmem>>, vector<8x8xbf16>,
    %129 = vector.extract_strided_slice %124 {offsets = [1, 0, 0], sizes = [1, 8, 8], strides = [1, 1, 1]} : vector<4x8x8xf32> to vector<1x8x8xf32>
    %130 = vector.shape_cast %129 : vector<1x8x8xf32> to vector<8x8xf32>
    %131 = arith.truncf %130 : vector<8x8xf32> to vector<8x8xbf16>
    %c0_82 = arith.constant 0 : index
    %c8 = arith.constant 8 : index
    %132 = vector.load %arg15[%c0_82, %c8] : memref<8x32xbf16, #tpu.memory_space<vmem>>, vector<8x8xbf16>
    tpu.vector_store %arg15[%c0_82, %c8], %131 {strides = array<i32>} : memref<8x32xbf16, #tpu.memory_space<vmem>>, vector<8x8xbf16>,
    %133 = vector.extract_strided_slice %124 {offsets = [2, 0, 0], sizes = [1, 8, 8], strides = [1, 1, 1]} : vector<4x8x8xf32> to vector<1x8x8xf32>
    %134 = vector.shape_cast %133 : vector<1x8x8xf32> to vector<8x8xf32>
    %135 = arith.truncf %134 : vector<8x8xf32> to vector<8x8xbf16>
    %c0_83 = arith.constant 0 : index
    %c16 = arith.constant 16 : index
    %136 = vector.load %arg15[%c0_83, %c16] : memref<8x32xbf16, #tpu.memory_space<vmem>>, vector<8x8xbf16>
    tpu.vector_store %arg15[%c0_83, %c16], %135 {strides = array<i32>} : memref<8x32xbf16, #tpu.memory_space<vmem>>, vector<8x8xbf16>,
    %137 = vector.extract_strided_slice %124 {offsets = [3, 0, 0], sizes = [1, 8, 8], strides = [1, 1, 1]} : vector<4x8x8xf32> to vector<1x8x8xf32>
    %138 = vector.shape_cast %137 : vector<1x8x8xf32> to vector<8x8xf32>
    %139 = arith.truncf %138 : vector<8x8xf32> to vector<8x8xbf16>
    %c0_84 = arith.constant 0 : index
    %c24 = arith.constant 24 : index
    %140 = vector.load %arg15[%c0_84, %c24] : memref<8x32xbf16, #tpu.memory_space<vmem>>, vector<8x8xbf16>
    tpu.vector_store %arg15[%c0_84, %c24], %139 {strides = array<i32>} : memref<8x32xbf16, #tpu.memory_space<vmem>>, vector<8x8xbf16>,
    %c0_85 = arith.constant 0 : index
    %c0_86 = arith.constant 0 : index
    %141 = vector.load %arg15[%c0_85, %c0_86] : memref<8x32xbf16, #tpu.memory_space<vmem>>, vector<8x32xbf16>
    %c0_87 = arith.constant 0 : index
    %c0_88 = arith.constant 0 : index
    %142 = vector.load %arg5[%c0_87, %c0_88] : memref<32x32xbf16, #tpu.memory_space<vmem>>, vector<32x32xbf16>
    %cst_89 = arith.constant dense<0.000000e+00> : vector<8x32xf32>
    %143 = tpu.matmul %141, %142, %cst_89 {dimension_numbers = #tpu.dot_dimension_numbers<[1], [0], [0], [1], [0, 0, 1, 1], [], []>} : vector<8x32xbf16>, vector<32x32xbf16>, vector<8x32xf32> -> vector<8x32xf32>
    %c0_90 = arith.constant 0 : index
    %c0_91 = arith.constant 0 : index
    %144 = vector.load %arg6[%c0_90, %c0_91] : memref<1x32xf32, #tpu.memory_space<vmem>>, vector<1x32xf32>
    %145 = vector.shape_cast %144 : vector<1x32xf32> to vector<32xf32>
    %146 = vector.shape_cast %145 : vector<32xf32> to vector<1x32xf32>
    %147 = vector.broadcast %146 : vector<1x32xf32> to vector<8x32xf32>
    %148 = arith.addf %143, %147 : vector<8x32xf32>
    %149 = arith.addf %1, %148 : vector<8x32xf32>
    %c0_92 = arith.constant 0 : index
    %c0_93 = arith.constant 0 : index
    %150 = vector.load %arg7[%c0_92, %c0_93] : memref<2x32xf32, #tpu.memory_space<vmem>>, vector<1x32xf32>
    %151 = vector.shape_cast %150 : vector<1x32xf32> to vector<32xf32>
    %c1_94 = arith.constant 1 : index
    %c0_95 = arith.constant 0 : index
    %152 = vector.load %arg7[%c1_94, %c0_95] : memref<2x32xf32, #tpu.memory_space<vmem>>, vector<1x32xf32>
    %153 = vector.shape_cast %152 : vector<1x32xf32> to vector<32xf32>
    %cst_96 = arith.constant dense<0.000000e+00> : vector<8xf32>
    %154 = vector.multi_reduction <add>, %149, %cst_96 [1] : vector<8x32xf32> to vector<8xf32>
    %155 = vector.shape_cast %154 : vector<8xf32> to vector<8x1xf32>
    %cst_97 = arith.constant 3.200000e+01 : f32
    %156 = vector.broadcast %cst_97 : f32 to vector<8x1xf32>
    %157 = arith.divf %155, %156 : vector<8x1xf32>
    %158 = vector.broadcast %157 : vector<8x1xf32> to vector<8x32xf32>
    %159 = arith.subf %149, %158 : vector<8x32xf32>
    %160 = arith.mulf %159, %159 : vector<8x32xf32>
    %cst_98 = arith.constant dense<0.000000e+00> : vector<8xf32>
    %161 = vector.multi_reduction <add>, %160, %cst_98 [1] : vector<8x32xf32> to vector<8xf32>
    %162 = vector.shape_cast %161 : vector<8xf32> to vector<8x1xf32>
    %cst_99 = arith.constant 3.200000e+01 : f32
    %163 = vector.broadcast %cst_99 : f32 to vector<8x1xf32>
    %164 = arith.divf %162, %163 : vector<8x1xf32>
    %165 = vector.broadcast %157 : vector<8x1xf32> to vector<8x32xf32>
    %166 = arith.subf %149, %165 : vector<8x32xf32>
    %cst_100 = arith.constant 9.99999974E-6 : f32
    %167 = vector.broadcast %cst_100 : f32 to vector<8x1xf32>
    %168 = arith.addf %164, %167 : vector<8x1xf32>
    %169 = math.rsqrt %168 : vector<8x1xf32>
    %170 = vector.broadcast %169 : vector<8x1xf32> to vector<8x32xf32>
    %171 = arith.mulf %166, %170 : vector<8x32xf32>
    %172 = vector.shape_cast %151 : vector<32xf32> to vector<1x32xf32>
    %173 = vector.broadcast %172 : vector<1x32xf32> to vector<8x32xf32>
    %174 = arith.mulf %171, %173 : vector<8x32xf32>
    %175 = vector.shape_cast %153 : vector<32xf32> to vector<1x32xf32>
    %176 = vector.broadcast %175 : vector<1x32xf32> to vector<8x32xf32>
    %177 = arith.addf %174, %176 : vector<8x32xf32>
    %178 = arith.truncf %177 : vector<8x32xf32> to vector<8x32xbf16>
    %c0_101 = arith.constant 0 : index
    %c0_102 = arith.constant 0 : index
    %179 = vector.load %arg8[%c0_101, %c0_102] : memref<32x128xbf16, #tpu.memory_space<vmem>>, vector<32x128xbf16>
    %cst_103 = arith.constant dense<0.000000e+00> : vector<8x128xf32>
    %180 = tpu.matmul %178, %179, %cst_103 {dimension_numbers = #tpu.dot_dimension_numbers<[1], [0], [0], [1], [0, 0, 1, 1], [], []>} : vector<8x32xbf16>, vector<32x128xbf16>, vector<8x128xf32> -> vector<8x128xf32>
    %c0_104 = arith.constant 0 : index
    %c0_105 = arith.constant 0 : index
    %181 = vector.load %arg9[%c0_104, %c0_105] : memref<1x128xf32, #tpu.memory_space<vmem>>, vector<1x128xf32>
    %182 = vector.shape_cast %181 : vector<1x128xf32> to vector<128xf32>
    %183 = vector.shape_cast %182 : vector<128xf32> to vector<1x128xf32>
    %184 = vector.broadcast %183 : vector<1x128xf32> to vector<8x128xf32>
    %185 = arith.addf %180, %184 : vector<8x128xf32>
    %cst_106 = arith.constant 1.702000e+00 : f32
    %186 = vector.broadcast %cst_106 : f32 to vector<8x128xf32>
    %187 = arith.mulf %186, %185 : vector<8x128xf32>
    %188 = arith.negf %187 : vector<8x128xf32>
    %189 = math.exp %188 : vector<8x128xf32>
    %cst_107 = arith.constant 1.000000e+00 : f32
    %190 = vector.broadcast %cst_107 : f32 to vector<8x128xf32>
    %191 = arith.addf %190, %189 : vector<8x128xf32>
    %192 = arith.divf %190, %191 : vector<8x128xf32>
    %193 = arith.mulf %185, %192 : vector<8x128xf32>
    %194 = arith.truncf %193 : vector<8x128xf32> to vector<8x128xbf16>
    %c0_108 = arith.constant 0 : index
    %c0_109 = arith.constant 0 : index
    %195 = vector.load %arg10[%c0_108, %c0_109] : memref<128x32xbf16, #tpu.memory_space<vmem>>, vector<128x32xbf16>
    %cst_110 = arith.constant dense<0.000000e+00> : vector<8x32xf32>
    %196 = tpu.matmul %194, %195, %cst_110 {dimension_numbers = #tpu.dot_dimension_numbers<[1], [0], [0], [1], [0, 0, 1, 1], [], []>} : vector<8x128xbf16>, vector<128x32xbf16>, vector<8x32xf32> -> vector<8x32xf32>
    %c0_111 = arith.constant 0 : index
    %c0_112 = arith.constant 0 : index
    %197 = vector.load %arg11[%c0_111, %c0_112] : memref<1x32xf32, #tpu.memory_space<vmem>>, vector<1x32xf32>
    %198 = vector.shape_cast %197 : vector<1x32xf32> to vector<32xf32>
    %199 = vector.shape_cast %198 : vector<32xf32> to vector<1x32xf32>
    %200 = vector.broadcast %199 : vector<1x32xf32> to vector<8x32xf32>
    %201 = arith.addf %196, %200 : vector<8x32xf32>
    %202 = arith.addf %149, %201 : vector<8x32xf32>
    %c0_113 = arith.constant 0 : index
    %c0_114 = arith.constant 0 : index
    %c0_115 = arith.constant 0 : index
    %203 = vector.load %arg12[%c0_113, %c0_114, %c0_115] : memref<1x8x32xf32, #tpu.memory_space<vmem>>, vector<1x8x32xf32>
    %204 = vector.shape_cast %203 : vector<1x8x32xf32> to vector<8x32xf32>
    %205 = vector.shape_cast %202 : vector<8x32xf32> to vector<1x8x32xf32>
    tpu.vector_store %arg12[%c0_113, %c0_114, %c0_115], %205 {strides = array<i32>} : memref<1x8x32xf32, #tpu.memory_space<vmem>>, vector<1x8x32xf32>,
    %cst_116 = arith.constant dense<0.000000e+00> : vector<8x8xf32>
    %206 = vector.multi_reduction <add>, %122, %cst_116 [0] : vector<4x8x8xf32> to vector<8x8xf32>
    %cst_117 = arith.constant 2.500000e-01 : f32
    %207 = vector.broadcast %cst_117 : f32 to vector<8x8xf32>
    %208 = arith.mulf %206, %207 : vector<8x8xf32>
    %c0_118 = arith.constant 0 : index
    %c0_119 = arith.constant 0 : index
    %c0_120 = arith.constant 0 : index
    %209 = vector.load %arg13[%c0_118, %c0_119, %c0_120] : memref<1x8x8xf32, #tpu.memory_space<vmem>>, vector<1x8x8xf32>
    %210 = vector.shape_cast %209 : vector<1x8x8xf32> to vector<8x8xf32>
    %211 = vector.shape_cast %208 : vector<8x8xf32> to vector<1x8x8xf32>
    tpu.vector_store %arg13[%c0_118, %c0_119, %c0_120], %211 {strides = array<i32>} : memref<1x8x8xf32, #tpu.memory_space<vmem>>, vector<1x8x8xf32>,
    return
  }
  func.func @transform_0(%arg0: i32) -> (i32, i32, i32) {
    %c0_i32 = arith.constant 0 : i32
    %c0_i32_0 = arith.constant 0 : i32
    %c0_i32_1 = arith.constant 0 : i32
    return %arg0, %c0_i32, %c0_i32_0 : i32, i32, i32
  }
  func.func @transform_1(%arg0: i32) -> (i32, i32) {
    %c0_i32 = arith.constant 0 : i32
    %c0_i32_0 = arith.constant 0 : i32
    %c0_i32_1 = arith.constant 0 : i32
    return %c0_i32, %c0_i32_0 : i32, i32
  }
  func.func @transform_2(%arg0: i32) -> (i32, i32) {
    %c0_i32 = arith.constant 0 : i32
    %c0_i32_0 = arith.constant 0 : i32
    %c0_i32_1 = arith.constant 0 : i32
    return %c0_i32, %c0_i32_0 : i32, i32
  }
  func.func @transform_3(%arg0: i32) -> (i32, i32) {
    %c0_i32 = arith.constant 0 : i32
    %c0_i32_0 = arith.constant 0 : i32
    %c0_i32_1 = arith.constant 0 : i32
    return %c0_i32, %c0_i32_0 : i32, i32
  }
  func.func @transform_4(%arg0: i32) -> (i32, i32) {
    %c0_i32 = arith.constant 0 : i32
    %c0_i32_0 = arith.constant 0 : i32
    %c0_i32_1 = arith.constant 0 : i32
    return %c0_i32, %c0_i32_0 : i32, i32
  }
  func.func @transform_5(%arg0: i32) -> (i32, i32) {
    %c0_i32 = arith.constant 0 : i32
    %c0_i32_0 = arith.constant 0 : i32
    %c0_i32_1 = arith.constant 0 : i32
    return %c0_i32, %c0_i32_0 : i32, i32
  }
  func.func @transform_6(%arg0: i32) -> (i32, i32) {
    %c0_i32 = arith.constant 0 : i32
    %c0_i32_0 = arith.constant 0 : i32
    %c0_i32_1 = arith.constant 0 : i32
    return %c0_i32, %c0_i32_0 : i32, i32
  }
  func.func @transform_7(%arg0: i32) -> (i32, i32) {
    %c0_i32 = arith.constant 0 : i32
    %c0_i32_0 = arith.constant 0 : i32
    %c0_i32_1 = arith.constant 0 : i32
    return %c0_i32, %c0_i32_0 : i32, i32
  }
  func.func @transform_8(%arg0: i32) -> (i32, i32) {
    %c0_i32 = arith.constant 0 : i32
    %c0_i32_0 = arith.constant 0 : i32
    %c0_i32_1 = arith.constant 0 : i32
    return %c0_i32, %c0_i32_0 : i32, i32
  }
  func.func @transform_9(%arg0: i32) -> (i32, i32) {
    %c0_i32 = arith.constant 0 : i32
    %c0_i32_0 = arith.constant 0 : i32
    %c0_i32_1 = arith.constant 0 : i32
    return %c0_i32, %c0_i32_0 : i32, i32
  }
  func.func @transform_10(%arg0: i32) -> (i32, i32) {
    %c0_i32 = arith.constant 0 : i32
    %c0_i32_0 = arith.constant 0 : i32
    %c0_i32_1 = arith.constant 0 : i32
    return %c0_i32, %c0_i32_0 : i32, i32
  }
  func.func @transform_11(%arg0: i32) -> (i32, i32, i32) {
    %c0_i32 = arith.constant 0 : i32
    %c0_i32_0 = arith.constant 0 : i32
    %c0_i32_1 = arith.constant 0 : i32
    return %arg0, %c0_i32, %c0_i32_0 : i32, i32, i32
  }
  func.func @transform_12(%arg0: i32) -> (i32, i32, i32) {
    %c0_i32 = arith.constant 0 : i32
    %c0_i32_0 = arith.constant 0 : i32
    %c0_i32_1 = arith.constant 0 : i32
    return %arg0, %c0_i32, %c0_i32_0 : i32, i32, i32
  }
}

</mosaic_0001>

<bundles_post_ra>
// kernel: transformer_for_clip.3
= control target key start
LH: loop header
LB: loop body
LE: loop exit
PB: predicated region body
PF: predicated region fallthrough
CT: control target
= control target key end

     0   :  { %s2153_s0 = inlined_call_operand.vmem [shape: f32[2,8,32], index: 0, kind: input, shape index: {}]   ;;  %s2154_s1 = inlined_call_operand.vmem [shape: f32[2,32], index: 1, kind: input, shape index: {}]   ;;  %s2155_s2 = inlined_call_operand.vmem [shape: bf16[32,96], index: 2, kind: input, shape index: {}]   ;;  %s2156_s3 = inlined_call_operand.vmem [shape: f32[1,96], index: 3, kind: input, shape index: {}]   ;;  %s2157_s4 = inlined_call_operand.vmem [shape: bf16[32,32], index: 4, kind: input, shape index: {}]   ;;  %s2158_s5 = inlined_call_operand.vmem [shape: f32[1,32], index: 5, kind: input, shape index: {}]   ;;  %s2159_s6 = inlined_call_operand.vmem [shape: f32[2,32], index: 6, kind: input, shape index: {}]   ;;  %s2160_s7 = inlined_call_operand.vmem [shape: bf16[32,128], index: 7, kind: input, shape index: {}]   ;;  %s2161_s8 = inlined_call_operand.vmem [shape: f32[1,128], index: 8, kind: input, shape index: {}]   ;;  %s2162_s9 = inlined_call_operand.vmem [shape: bf16[128,32], index: 9, kind: input, shape index: {}]   ;;  %s2163_s10 = inlined_call_operand.vmem [shape: f32[1,32], index: 10, kind: input, shape index: {}]   ;;  %s2164_s11 = inlined_call_operand.vmem [shape: f32[2,8,32], index: 11, kind: output, shape index: {0}]   ;;  %s2165_s12 = inlined_call_operand.hbm [shape: f32[2,8,8], index: 12, kind: output, shape index: {1}]  }
   0x1   :  { %2169 = sst [smem:[#allocation7_spill]] %s2153_s0 }
   0x2   :  { %2170 = sst [smem:[#allocation8_spill]] %s2154_s1 }
   0x3   :  { %2171 = sst [smem:[#allocation9_spill]] %s2155_s2 }
   0x4   :  { %2172 = sst [smem:[#allocation10_spill]] %s2156_s3 }
   0x5   :  { %2173 = sst [smem:[#allocation11_spill]] %s2157_s4 }
   0x6   :  { %18 = vsyncpa [#allocation5], 0 }
   0x7   :  { %20 = vsyncpa [#allocation5 + $0x1], 0  ;;  %s1856_s21 = smov 0   ;;  %s1858_s22 = smov 0  }
   0x8   :  { %s1860_s23 = smov 0   ;;  %s1862_s24 = smov 0  }
   0x9 LB: > { %s1877_s25 = sadd.s32 4294967295, %s1772_s24   ;;  %s1436_s26 = sadd.s32 4294967294, %s1772_s24   ;;  %s1772_s24 = sphi %s1862_s24, %s2187_s24   ;;  %s1768_s23 = sphi %s1860_s23, %s2186_s23   ;;  %s1764_s22 = sphi %s1858_s22, %s2185_s22   ;;  %s1760_s21 = sphi %s1856_s21, %s2184_s21  }
   0xa   : > { %s1881_s27 = sadd.s32 1, %s1772_s24   ;;  %s295_s28 = sadd.s32 1, %s1768_s23 }
   0xb   : > { %s292_s29 = ssub.s32 %s1772_s24, %s1881_s27  ;;  %p305_p0 = scmp.ne.s32.totalorder %s1768_s23, %s1764_s22 }
   0xc   : > { %p293_p1 = scmp.eq.s32.totalorder %s292_s29, 0  ;;  %p306_p2 = scmp.eq.s32.totalorder %s1877_s25, 1 }
   0xd   : > { %p311_p3 = scmp.ne.s32.totalorder %s1764_s22, %s1760_s21  ;;  %p312_p4 = scmp.eq.s32.totalorder %s1436_s26, 1 }
   0xe   : > { %s1892_s30 = scalar_select %p293_p1, %s1768_s23, %s295_s28  }
   0xf   : > { %p1894_p5 = por %p306_p2, %p305_p0  ;;  %p1898_p6 = por %p312_p4, %p311_p3 }
  0x10   : > { %p1439_p7 = scmp.ge.s32.totalorder %s1772_s24, 1  ;;  %p367_p8 = scmp.lt.s32.totalorder %s1772_s24, 3 }
  0x12   : > { %p368_p9 = pnand %p1439_p7, %p367_p8 }
  0x13   : > { %p412_p10 = scmp.lt.s32.totalorder (!%p368_p9), %s1877_s25, 1  ;;  %vm424_vm0 = vcmask (!%p368_p9), 261120   ;;  %s2176_s0 = sld [smem:[#allocation7_spill]] (!%p368_p9)  ;;  %v1774_v8 = vmov (!%p368_p9), 0.0   ;;  %vm1775_vm1 = vmmov (!%p368_p9), 0   ;;  %vm518_vm2 = vcmask (!%p368_p9), 60416  }
  0x14   : > { %371 = sbr.rel (%p368_p9) target bundleno = 2578 (0xa12), region = 64  ;;  %s2177_s2 = sld [smem:[#allocation9_spill]] (!%p368_p9)  ;;  %1525 = vmatprep.subr.bf16.mxu0 (!%p368_p9), %v1774_v8  ;;  %1529 = vmatprep.mubr.msk.bf16.mxu0 (!%p368_p9), %vm1775_vm1, %v1774_v8  ;;  %vm594_vm3 = vcmask (!%p368_p9), 64512   ;;  %vm830_vm4 = vcmask (!%p368_p9), 1043456   ;;  %vm1021_vm5 = vcmask (!%p368_p9), 126016   ;;  %vm1030_vm6 = vcmask (!%p368_p9), 191616  }
  0x15   : > { %1545 = vmatprep.subr.bf16.mxu1 (!%p368_p9), %v1774_v8  ;;  %1547 = vmatprep.mubr.msk.bf16.mxu1 (!%p368_p9), %vm1775_vm1, %v1774_v8  ;;  %s2178_s1 = sld [smem:[#allocation8_spill]] (!%p368_p9)  ;;  %s2179_s3 = sld [smem:[#allocation10_spill]] (!%p368_p9)  ;;  %vm1039_vm7 = vcmask (!%p368_p9), 257216  }
  0x16   : > { %s1776_s29 = smov (!%p368_p9), 80   ;;  %s1777_s17 = smov (!%p368_p9), 96  }
  0x17   : > { %s1778_s18 = smov (!%p368_p9), 88   ;;  %s1780_s20 = smov (!%p368_p9), 120  }
  0x18   : > { %s1781_s26 = smov (!%p368_p9), 112   ;;  %s1782_s28 = smov (!%p368_p9), 104  }
  0x19   : > { %s2180_s4 = sld [smem:[#allocation11_spill]] (!%p368_p9) }
  0x1a   : > { %v1672_v7 = vld [vmem:[%s2177_s2] sm:$0xff] (!%p368_p9)   ;;  %v1673_v9 = vld [vmem:[%s2177_s2 + $0x8] sm:$0xff] (!%p368_p9)   ;;  %s1790_s2 = smov (!%p368_p9), [#allocation4]  }
  0x1b   : > { %s1906_s15 = scalar_select %p412_p10, %s1877_s25, 1  ;;  %1526 = vmatpush3.bf16.msra.mxu0 %v1672_v7  ;;  %v1443_v14 = vld [vmem:[%s2178_s1] ss:$0 sm:$0xff]  ;;  %v1444_v16 = vld [vmem:[%s2178_s1 + $0x1] ss:$0 sm:$0xff] }
  0x1c   : > { %1527 = vmatprep.subr.bf16.mxu0 %v1774_v8  ;;  %v1445_v20 = vld [vmem:[%s2179_s3] ss:$0 sm:$0xff]  ;;  %s1714_s3 = sshll.u32 %s1790_s2, 4  ;;  %s1715_s3 = int_to_ptr.vmem [resolvable:$false] %s1714_s3 }
  0x1d   : > { %s2166_s16 = sshll.u32 %s1906_s15, 3 }
  0x1e   : > { %s415_s19 = scalar_lea.vmem %s2176_s0, %s2166_s16  ;;  %s1483_s0 = sshll.u32 %s1877_s25, 7 }
  0x1f   : > { %v1914_v0 = vld [vmem:[%s415_s19] sm:$0xff]  ;;  %1528 = vmatpush3.bf16.msra.mxu0 %v1673_v9  ;;  %s1779_s19 = smov 72  }
  0x20   : > { %v425_v1 = vsel %vm424_vm0, %v1914_v0, 0.0  ;;  %1533 = vmatprep.subr.bf16.mxu0 %v1774_v8 }
  0x21   : > { %426 = vadd.xlane.f32.xlu0 %v425_v1 }
  0xae   : > { %v427_v2 = vpop.xlane.xlu0 %426 }
  0xaf   : > { %v429_v3 = vmul.f32 0.03125, %v427_v2 }
  0xb1   : > { %v430_v4 = vsub.f32 %v1914_v0, %v429_v3 }
  0xb3   : > { %v431_v5 = vmul.f32 %v430_v4, %v430_v4 }
  0xb5   : > { %v432_v6 = vsel %vm424_vm0, %v431_v5, 0.0 }
  0xb6   : > { %433 = vadd.xlane.f32.xlu0 %v432_v6 }
 0x143   : > { %v434_v10 = vpop.xlane.xlu0 %433 }
 0x144   : > { %v435_v11 = vmul.f32 0.03125, %v434_v10 }
 0x146   : > { %v436_v12 = vadd.f32 1e-05, %v435_v11 }
 0x148   : > { %1686 = vrsqrt.f32 %v436_v12 }
 0x152   : > { %v1687_v13 = vpop.eup %1686 }
 0x153   : > { %v438_v15 = vmul.f32 %v1687_v13, %v430_v4 }
 0x155   : > { %v443_v17 = vmul.f32 %v1443_v14, %v438_v15 }
 0x157   : > { %v448_v18 = vadd.f32 %v1444_v16, %v443_v17 }
 0x159   : > { %v449_v19 = vpack.c.bf16 %v448_v18, %v448_v18 }
 0x15b   : > { %1530 = vmatmul.mubr.msk.bf16.vlgmr.msra.gmra.mrb[0].mxu0 %vm424_vm0, %v449_v19 }
 0x15c   : > { %1535 = vmatprep.mubr.msk.bf16.mxu0 %vm1775_vm1, %v1774_v8 }
 0x22e   : > { %v510_v21 = vpop.f32.mrb[0].mxu0 }
 0x22f   : > { %v511_v22 = vadd.f32 %v1445_v20, %v510_v21  ;;  %v1531_v23 = vpop.f32.mrb[1].mxu0 }
 0x230   : > { %v513_v24 = vpop.f32.mrb[2].mxu0 }
 0x231   : > { %v516_v25 = vmul.f32 0.35355338, %v511_v22  ;;  %v1946_v26 = vpack.c.bf16 %v511_v22, %v511_v22  ;;  %v1532_v27 = vpop.f32.mrb[3].mxu0 }
 0x233   : > { %v517_v28 = vpack.c.bf16 %v516_v25, %v516_v25  ;;  %557 = vrot.lane.b32.xlu0 %v1946_v26, %s1776_s29  ;;  %524 = vrot.lane.b32.xlu1 %v1946_v26, %s1777_s17  ;;  %s1783_s29 = smov 64   ;;  %s1784_s17 = smov 48  }
 0x235   : > { %519 = vst.msk [vmem:[#allocation2] sm:$0xf] %vm518_vm2, %v517_v28 }
 0x237   : > { %542 = vrot.lane.b32.xlu1 %v1946_v26, %s1778_s18  ;;  %s1785_s18 = smov 40  }
 0x23b   : > { %572 = vrot.lane.b32.xlu1 %v1946_v26, %s1779_s19  ;;  %s1786_s19 = smov 56  }
 0x23c   : > { %v582_v40 = vld [vmem:[#allocation2] sm:$0xf] }
 0x23f   : > { %537 = vrot.lane.b32.xlu1 %v517_v28, %s1780_s20  ;;  %s2167_s20 = sand.u32 1, %s1764_s22  }
 0x243   : > { %552 = vrot.lane.b32.xlu1 %v517_v28, %s1781_s26  ;;  %s2013_s26 = sshll.u32 %s2167_s20, 3  ;;  %s1788_s20 = smov 8  }
 0x244   : > { %s2181_s16 = scalar_lea.vmem [#allocation4], %s2013_s26 }
 0x247   : > { %567 = vrot.lane.b32.xlu1 %v517_v28, %s1782_s28  ;;  %s2168_s28 = scalar_lea.vmem [#allocation4], %s2013_s26 }
 0x2a5   : > { %v558_v29 = vpop.permute.xlu0 %557  ;;  %v525_v30 = vpop.permute.xlu1 %524 }
 0x2a6   : > { %561 = vst.msk [vmem:[#allocation2 + $0x18] sm:$0xf] %vm518_vm2, %v558_v29  ;;  %528 = vst.msk [vmem:[#allocation2 + $0x10] sm:$0xf] %vm518_vm2, %v525_v30 }
 0x2a9   : > { %v543_v31 = vpop.permute.xlu1 %542 }
 0x2aa   : > { %546 = vst.msk [vmem:[#allocation2 + $0x14] sm:$0xf] %vm518_vm2, %v543_v31 }
 0x2ad   : > { %v573_v32 = vpop.permute.xlu1 %572  ;;  %v586_v33 = vld [vmem:[#allocation2 + $0x10] sm:$0xf]  ;;  %v588_v34 = vld [vmem:[#allocation2 + $0x18] sm:$0xf] }
 0x2ae   : > { %576 = vst.msk [vmem:[#allocation2 + $0x1c] sm:$0xf] %vm518_vm2, %v573_v32  ;;  %v599_v35 = vsel %vm594_vm3, %v586_v33, 0  ;;  %v691_v36 = vsel %vm594_vm3, %v588_v34, 0 }
 0x2af   : > { %1534 = vmatpush3.bf16.xpose.msra.mxu0 %v599_v35  ;;  %1546 = vmatpush3.bf16.xpose.msra.mxu1 %v691_v36 }
 0x2b0   : > { %1539 = vmatprep.subr.bf16.mxu0 %v1774_v8  ;;  %1557 = vmatprep.subr.bf16.mxu1 %v1774_v8 }
 0x2b1   : > { %v538_v37 = vpop.permute.xlu1 %537  ;;  %v587_v38 = vld [vmem:[#allocation2 + $0x14] sm:$0xf] }
 0x2b2   : > { %541 = vst.msk [vmem:[#allocation2 + $0x4] sm:$0xf] %vm518_vm2, %v538_v37  ;;  %v645_v41 = vsel %vm594_vm3, %v587_v38, 0 }
 0x2b5   : > { %v553_v39 = vpop.permute.xlu1 %552  ;;  %v589_v43 = vld [vmem:[#allocation2 + $0x1c] sm:$0xf] }
 0x2b6   : > { %556 = vst.msk [vmem:[#allocation2 + $0x8] sm:$0xf] %vm518_vm2, %v553_v39  ;;  %1536 = vmatmul.mubr.msk.bf16.vlgmr.msra.gmra.mrb[4].mxu0 %vm594_vm3, %v582_v40  ;;  %v737_v46 = vsel %vm594_vm3, %v589_v43, 0 }
 0x2b7   : > { %1540 = vmatpush3.bf16.xpose.msra.mxu0 %v645_v41  ;;  %1541 = vmatprep.mubr.msk.bf16.mxu0 %vm1775_vm1, %v1774_v8 }
 0x2b8   : > { %1551 = vmatprep.subr.bf16.mxu0 %v1774_v8 }
 0x2b9   : > { %v568_v42 = vpop.permute.xlu1 %567  ;;  %v583_v44 = vld [vmem:[#allocation2 + $0x4] sm:$0xf] }
 0x2ba   : > { %571 = vst.msk [vmem:[#allocation2 + $0xc] sm:$0xf] %vm518_vm2, %v568_v42 }
 0x2bd   : > { %v584_v45 = vld [vmem:[#allocation2 + $0x8] sm:$0xf] }
 0x2be   : > { %1542 = vmatmul.mubr.msk.bf16.vlgmr.msra.gmra.mrb[8].mxu0 %vm594_vm3, %v583_v44  ;;  %1548 = vmatmul.mubr.msk.bf16.vlgmr.msra.gmra.mrb[0].mxu1 %vm594_vm3, %v584_v45 }
 0x2bf   : > { %1552 = vmatpush3.bf16.xpose.msra.mxu0 %v737_v46  ;;  %1553 = vmatprep.mubr.msk.bf16.mxu0 %vm1775_vm1, %v1774_v8 }
 0x2c0   : > { %1559 = vmatprep.mubr.msk.bf16.mxu1 %vm1775_vm1, %v1774_v8  ;;  %1563 = vmatprep.subr.bf16.mxu0 %v1774_v8 }
 0x2c1   : > { %v585_v47 = vld [vmem:[#allocation2 + $0xc] sm:$0xf] }
 0x2c6   : > { %1554 = vmatmul.mubr.msk.bf16.vlgmr.msra.gmra.mrb[12].mxu0 %vm594_vm3, %v585_v47 }
 0x2c7   : > { %1565 = vmatprep.mubr.msk.bf16.mxu0 %vm1775_vm1, %v1774_v8 }
 0x389   : > { %v635_v48 = vpop.f32.mrb[4].mxu0 }
 0x38a   : > { %v1537_v49 = vpop.f32.mrb[5].mxu0  ;;  %v779_v50 = vsel %vm594_vm3, %v635_v48, -inf }
 0x38b   : > { %780 = vmax.xlane.f32.xlu1 %v779_v50  ;;  %v638_v51 = vpop.f32.mrb[6].mxu0 }
 0x38c   : > { %v1538_v52 = vpop.f32.mrb[7].mxu0 }
 0x391   : > { %v681_v53 = vpop.f32.mrb[8].mxu0  ;;  %v727_v54 = vpop.f32.mrb[0].mxu1 }
 0x392   : > { %v1543_v55 = vpop.f32.mrb[9].mxu0  ;;  %v1549_v56 = vpop.f32.mrb[1].mxu1  ;;  %v785_v57 = vsel %vm594_vm3, %v727_v54, -inf  ;;  %v782_v58 = vsel %vm594_vm3, %v681_v53, -inf }
 0x393   : > { %v730_v59 = vpop.f32.mrb[2].mxu1  ;;  %786 = vmax.xlane.f32.xlu1 %v785_v57  ;;  %783 = vmax.xlane.f32.xlu0 %v782_v58  ;;  %v684_v60 = vpop.f32.mrb[10].mxu0 }
 0x394   : > { %v1544_v61 = vpop.f32.mrb[11].mxu0  ;;  %v1550_v62 = vpop.f32.mrb[3].mxu1 }
 0x399   : > { %v773_v63 = vpop.f32.mrb[12].mxu0 }
 0x39a   : > { %v1555_v1 = vpop.f32.mrb[13].mxu0  ;;  %v788_v2 = vsel %vm594_vm3, %v773_v63, -inf }
 0x39b   : > { %789 = vmax.xlane.f32.xlu0 %v788_v2  ;;  %v776_v3 = vpop.f32.mrb[14].mxu0 }
 0x39c   : > { %v1556_v4 = vpop.f32.mrb[15].mxu0 }
 0x3a4   : > { %529 = vrot.lane.b32.xlu1 %v1946_v26, %s1783_s29  ;;  %s1787_s29 = smov 16  }
 0x418   : > { %v781_v5 = vpop.xlane.xlu1 %780 }
 0x419   : > { %v791_v6 = vsub.f32 %v635_v48, %v781_v5 }
 0x41b   : > { %v795_v7 = vmul.f32 1.442695, %v791_v6 }
 0x41d   : > { %1688 = vpow2.f32 %v795_v7 }
 0x420   : > { %v787_v9 = vpop.xlane.xlu1 %786  ;;  %v784_v10 = vpop.xlane.xlu0 %783 }
 0x421   : > { %v793_v11 = vsub.f32 %v727_v54, %v787_v9  ;;  %v792_v12 = vsub.f32 %v681_v53, %v784_v10  ;;  %v1674_v10 = vld [vmem:[%s2180_s4] sm:$0xff]  }
 0x423   : > { %v799_v13 = vmul.f32 1.442695, %v793_v11  ;;  %v797_v14 = vmul.f32 1.442695, %v792_v12  ;;  %v1675_v12 = vld [vmem:[%s2180_s4 + $0x8] sm:$0xff]   ;;  %s1716_s4 = scalar_lea.vmem %s1715_s3, 256 }
 0x424   : > { %v530_v15 = vpop.permute.xlu1 %529 }
 0x425   : > { %1690 = vpow2.f32 %v799_v13  ;;  %533 = vst.msk [vmem:[#allocation2 + $0x20] sm:$0xf] %vm518_vm2, %v530_v15 }
 0x426   : > { %1692 = vpow2.f32 %v797_v14 }
 0x427   : > { %v1689_v16 = vpop.eup %1688 }
 0x428   : > { %v790_v17 = vpop.xlane.xlu0 %789  ;;  %v803_v18 = vsel %vm594_vm3, %v1689_v16, 0.0 }
 0x429   : > { %v794_v19 = vsub.f32 %v773_v63, %v790_v17  ;;  %804 = vadd.xlane.f32.xlu1 %v803_v18 }
 0x42b   : > { %v801_v20 = vmul.f32 1.442695, %v794_v19 }
 0x42c   : > { %v590_v21 = vld [vmem:[#allocation2 + $0x20] sm:$0xf] }
 0x42d   : > { %1694 = vpow2.f32 %v801_v20  ;;  %v832_v22 = vsel %vm830_vm4, %v590_v21, 0 }
 0x42e   : > { %1558 = vmatpush3.bf16.msra.mxu1 %v832_v22 }
 0x42f   : > { %v1691_v23 = vpop.eup %1690  ;;  %1569 = vmatprep.subr.bf16.mxu1 %v1774_v8 }
 0x430   : > { %v1693_v24 = vpop.eup %1692  ;;  %v809_v25 = vsel %vm594_vm3, %v1691_v23, 0.0 }
 0x431   : > { %810 = vadd.xlane.f32.xlu1 %v809_v25  ;;  %v806_v27 = vsel %vm594_vm3, %v1693_v24, 0.0 }
 0x432   : > { %807 = vadd.xlane.f32.xlu0 %v806_v27  ;;  %v1462_v27 = vld [vmem:[%s2158_s5] ss:$0 sm:$0xff] }
 0x437   : > { %v1695_v28 = vpop.eup %1694 }
 0x438   : > { %v812_v29 = vsel %vm594_vm3, %v1695_v28, 0.0 }
 0x439   : > { %813 = vadd.xlane.f32.xlu0 %v812_v29 }
 0x442   : > { %562 = vrot.lane.b32.xlu1 %v1946_v26, %s1784_s17 }
 0x446   : > { %577 = vrot.lane.b32.xlu1 %v1946_v26, %s1785_s18 }
 0x44f   : > { %547 = vrot.lane.b32.xlu0 %v1946_v26, %s1786_s19  ;;  %s2105_s19 = scalar_lea.hbm %s2165_s12, %s1483_s0 }
 0x4b6   : > { %v805_v30 = vpop.xlane.xlu1 %804 }
 0x4b7   : > { %1696 = vrcp.f32 %v805_v30 }
 0x4be   : > { %v811_v31 = vpop.xlane.xlu1 %810 }
 0x4bf   : > { %1698 = vrcp.f32 %v811_v31  ;;  %v808_v32 = vpop.xlane.xlu0 %807 }
 0x4c0   : > { %1700 = vrcp.f32 %v808_v32 }
 0x4c1   : > { %v1697_v33 = vpop.eup %1696 }
 0x4c2   : > { %v819_v34 = vmul.f32 %v1697_v33, %v1689_v16  ;;  %v563_v35 = vpop.permute.xlu1 %562 }
 0x4c3   : > { %566 = vst.msk [vmem:[#allocation2 + $0x28] sm:$0xf] %vm518_vm2, %v563_v35 }
 0x4c4   : > { %v823_v36 = vpack.c.bf16 %v819_v34, %v819_v34  ;;  %v1323_v47 = vsel %vm594_vm3, %v819_v34, 0.0 }
 0x4c6   : > { %1560 = vmatmul.mubr.msk.bf16.vlgmr.msra.gmra.mrb[4].mxu1 %vm594_vm3, %v823_v36  ;;  %v578_v37 = vpop.permute.xlu1 %577  ;;  %v814_v38 = vpop.xlane.xlu0 %813 }
 0x4c7   : > { %581 = vst.msk [vmem:[#allocation2 + $0x2c] sm:$0xf] %vm518_vm2, %v578_v37  ;;  %1702 = vrcp.f32 %v814_v38  ;;  %1571 = vmatprep.mubr.msk.bf16.mxu1 %vm1775_vm1, %v1774_v8 }
 0x4c9   : > { %v1699_v26 = vpop.eup %1698 }
 0x4ca   : > { %v1701_v39 = vpop.eup %1700  ;;  %v821_v40 = vmul.f32 %v1699_v26, %v1691_v23  ;;  %v548_v41 = vpop.permute.xlu0 %547  ;;  %v592_v42 = vld [vmem:[#allocation2 + $0x28] sm:$0xf] }
 0x4cb   : > { %v820_v43 = vmul.f32 %v1701_v39, %v1693_v24  ;;  %551 = vst.msk [vmem:[#allocation2 + $0x24] sm:$0xf] %vm518_vm2, %v548_v41  ;;  %v924_v44 = vsel %vm830_vm4, %v592_v42, 0  ;;  %v1676_v39 = vld [vmem:[%s2160_s7] sm:$0xff]  }
 0x4cc   : > { %1570 = vmatpush3.bf16.msra.mxu1 %v924_v44  ;;  %v825_v45 = vpack.c.bf16 %v821_v40, %v821_v40  ;;  %v1326_v52 = vsel %vm594_vm3, %v821_v40, 0.0  ;;  %v1466_v44 = vld [vmem:[%s2159_s6] ss:$0 sm:$0xff] }
 0x4cd   : > { %1581 = vmatprep.subr.bf16.mxu1 %v1774_v8  ;;  %v1324_v46 = vsel %vm594_vm3, %v820_v43, 0.0  ;;  %v824_v57 = vpack.c.bf16 %v820_v43, %v820_v43 }
 0x4ce   : > { %v1325_v48 = vadd.f32 %v1324_v46, %v1323_v47  ;;  %v593_v55 = vld [vmem:[#allocation2 + $0x2c] sm:$0xf]  ;;  %v1467_v46 = vld [vmem:[%s2159_s6 + $0x1] ss:$0 sm:$0xff] }
 0x4cf   : > { %1572 = vmatmul.mubr.msk.bf16.vlgmr.msra.gmra.mrb[8].mxu1 %vm594_vm3, %v825_v45  ;;  %v970_v59 = vsel %vm830_vm4, %v593_v55, 0  ;;  %v1683_v55 = vld [vmem:[%s2162_s9 + $0x28] sm:$0xff]  }
 0x4d0   : > { %1585 = vmatprep.mubr.msk.bf16.mxu1 %vm1775_vm1, %v1774_v8  ;;  %v1327_v54 = vadd.f32 %v1326_v52, %v1325_v48  ;;  %1582 = vmatpush3.bf16.msra.mxu1 %v1674_v10  ;;  %v1680_v52 = vld [vmem:[%s2162_s9 + $0x10] sm:$0xff]  }
 0x4d1   : > { %v1703_v49 = vpop.eup %1702  ;;  %1583 = vmatprep.subr.bf16.mxu1 %v1774_v8 }
 0x4d2   : > { %v822_v50 = vmul.f32 %v1703_v49, %v1695_v28  ;;  %v591_v51 = vld [vmem:[#allocation2 + $0x24] sm:$0xf] }
 0x4d3   : > { %v878_v53 = vsel %vm830_vm4, %v591_v51, 0  ;;  %v1679_v51 = vld [vmem:[%s2162_s9 + $0x8] sm:$0xff]  }
 0x4d4   : > { %1564 = vmatpush3.bf16.msra.mxu0 %v878_v53  ;;  %v1328_v56 = vsel %vm594_vm3, %v822_v50, 0.0  ;;  %v826_v61 = vpack.c.bf16 %v822_v50, %v822_v50  ;;  %1584 = vmatpush3.bf16.msra.mxu1 %v1675_v12  ;;  %v1678_v50 = vld [vmem:[%s2162_s9] sm:$0xff]   ;;  %v1681_v53 = vld [vmem:[%s2162_s9 + $0x18] sm:$0xff]  }
 0x4d5   : > { %1575 = vmatprep.subr.bf16.mxu0 %v1774_v8  ;;  %v1329_v58 = vadd.f32 %v1328_v56, %v1327_v54  ;;  %1597 = vmatprep.subr.bf16.mxu1 %v1774_v8  ;;  %v1682_v54 = vld [vmem:[%s2162_s9 + $0x20] sm:$0xff]   ;;  %v1684_v56 = vld [vmem:[%s2162_s9 + $0x30] sm:$0xff]  }
 0x4d7   : > { %1566 = vmatmul.mubr.msk.bf16.vlgmr.msra.gmra.mrb[16].mxu0 %vm594_vm3, %v824_v57  ;;  %v1330_v60 = vmul.f32 0.25, %v1329_v58  ;;  %v1685_v57 = vld [vmem:[%s2162_s9 + $0x38] sm:$0xff]   ;;  %v1468_v58 = vld [vmem:[%s2161_s8] ss:$0 sm:$0xff] }
 0x4d8   : > { %1576 = vmatpush3.bf16.msra.mxu0 %v970_v59  ;;  %1577 = vmatprep.mubr.msk.bf16.mxu0 %vm1775_vm1, %v1774_v8 }
 0x4d9   : > { %1589 = vmatprep.subr.bf16.mxu0 %v1774_v8  ;;  %1331 = vst.msk [vmem:[%s2168_s28] sm:$0xff] %vm594_vm3, %v1330_v60 }
 0x4df   : > { %1578 = vmatmul.mubr.msk.bf16.vlgmr.msra.gmra.mrb[20].mxu0 %vm594_vm3, %v826_v61 }
 0x4e0   : > { %1593 = vmatprep.mubr.msk.bf16.mxu0 %vm1775_vm1, %v1774_v8  ;;  %1590 = vmatpush3.bf16.msra.mxu0 %v1676_v39 }
 0x4e1   : > { %1591 = vmatprep.subr.bf16.mxu0 %v1774_v8 }
 0x599   : > { %v868_v62 = vpop.f32.mrb[4].mxu1 }
 0x59a   : > { %v1012_v63 = vpack.c.bf16 %v868_v62, %v868_v62  ;;  %v1561_v1 = vpop.f32.mrb[5].mxu1 }
 0x59b   : > { %v871_v2 = vpop.f32.mrb[6].mxu1 }
 0x59c   : > { %1013 = vst.msk [vmem:[#allocation3] sm:$0xf] %vm518_vm2, %v1012_v63  ;;  %v1562_v3 = vpop.f32.mrb[7].mxu1 }
 0x5a2   : > { %v960_v4 = vpop.f32.mrb[8].mxu1 }
 0x5a3   : > { %v1489_v5 = vpack.c.bf16 %v960_v4, %v960_v4  ;;  %v1573_v6 = vpop.f32.mrb[9].mxu1 }
 0x5a4   : > { %v963_v7 = vpop.f32.mrb[10].mxu1 }
 0x5a5   : > { %1027 = vrot.lane.b32.xlu1 %v1489_v5, %s1787_s29  ;;  %v1574_v9 = vpop.f32.mrb[11].mxu1  ;;  %s1789_s29 = smov 24  }
 0x5aa   : > { %v914_v11 = vpop.f32.mrb[16].mxu0 }
 0x5ab   : > { %v1488_v13 = vpack.c.bf16 %v914_v11, %v914_v11  ;;  %v1567_v14 = vpop.f32.mrb[17].mxu0 }
 0x5ac   : > { %v917_v15 = vpop.f32.mrb[18].mxu0 }
 0x5ad   : > { %1018 = vrot.lane.b32.xlu0 %v1488_v13, %s1788_s20  ;;  %v1568_v16 = vpop.f32.mrb[19].mxu0  ;;  %s1353_s20 = sshll.u32 %s2181_s16, 4  ;;  %s1354_s20 = int_to_ptr.vmem [resolvable:$true] %s1353_s20 }
 0x5ae   : > { %s1710_s1 = scalar_lea.vmem %s1354_s20, 128  ;;  %p1717_p0 = scmp.lt.s32.totalorder %s1354_s20, %s1715_s3 }
 0x5af   : > { %p1711_p11 = scmp.ne.s32.totalorder %s1354_s20, %s1710_s1  ;;  %p1718_p1 = scmp.lt.s32.totalorder %s1716_s4, %s1710_s1 }
 0x5b1   : > { %p1712_p12 = pnand %p1711_p11, %p1894_p5  ;;  %p1719_p2 = por %p1718_p1, %p1717_p0 }
 0x5b2   : > { %v1006_v17 = vpop.f32.mrb[20].mxu0 }
 0x5b3   : > { %v1490_v18 = vpack.c.bf16 %v1006_v17, %v1006_v17  ;;  %v1579_v19 = vpop.f32.mrb[21].mxu0  ;;  %p1713_p13 = pneg %p1712_p12 }
 0x5b4   : > { %v1009_v20 = vpop.f32.mrb[22].mxu0 }
 0x5b5   : > { %1036 = vrot.lane.b32.xlu0 %v1490_v18, %s1789_s29  ;;  %v1580_v21 = vpop.f32.mrb[23].mxu0  ;;  %s2182_s29 = sand.u32 1, %s1764_s22   ;;  %p1720_p3 = pnand %p1719_p2, %p1713_p13 }
 0x5b6   : > { %s1337_s28 = scalar_lea.sflag [#allocation5], %s2182_s29 }
 0x617   : > { %v1028_v23 = vpop.permute.xlu1 %1027 }
 0x61f   : > { %v1019_v22 = vpop.permute.xlu0 %1018 }
 0x620   : > { %1022 = vst.msk [vmem:[#allocation3] sm:$0xf] %vm1021_vm5, %v1019_v22 }
 0x621   : > { %1031 = vst.msk [vmem:[#allocation3] sm:$0xf] %vm1030_vm6, %v1028_v23 }
 0x627   : > { %v1037_v24 = vpop.permute.xlu0 %1036 }
 0x628   : > { %1040 = vst.msk [vmem:[#allocation3] sm:$0xf] %vm1039_vm7, %v1037_v24 }
 0x62f   : > { %v1041_v25 = vld [vmem:[#allocation3] sm:$0xf] }
 0x630   : > { %1586 = vmatmul.mubr.msk.bf16.vlgmr.msra.gmra.mrb[12].mxu1 %vm424_vm0, %v1041_v25 }
 0x631   : > { %1613 = vmatprep.mubr.msk.bf16.mxu1 %vm1775_vm1, %v1774_v8  ;;  %1598 = vmatpush3.bf16.msra.mxu1 %v1678_v50 }
 0x632   : > { %1599 = vmatprep.subr.bf16.mxu1 %v1774_v8 }
 0x635   : > { %1600 = vmatpush3.bf16.msra.mxu1 %v1679_v51 }
 0x636   : > { %1601 = vmatprep.subr.bf16.mxu1 %v1774_v8 }
 0x639   : > { %1602 = vmatpush3.bf16.msra.mxu1 %v1680_v52 }
 0x63a   : > { %1603 = vmatprep.subr.bf16.mxu1 %v1774_v8 }
 0x63d   : > { %1604 = vmatpush3.bf16.msra.mxu1 %v1681_v53 }
 0x63e   : > { %1605 = vmatprep.subr.bf16.mxu1 %v1774_v8 }
 0x641   : > { %1606 = vmatpush3.bf16.msra.mxu1 %v1682_v54 }
 0x642   : > { %1607 = vmatprep.subr.bf16.mxu1 %v1774_v8 }
 0x645   : > { %1608 = vmatpush3.bf16.msra.mxu1 %v1683_v55 }
 0x646   : > { %1609 = vmatprep.subr.bf16.mxu1 %v1774_v8 }
 0x649   : > { %1610 = vmatpush3.bf16.msra.mxu1 %v1684_v56 }
 0x64a   : > { %1611 = vmatprep.subr.bf16.mxu1 %v1774_v8 }
 0x64d   : > { %1612 = vmatpush3.bf16.msra.mxu1 %v1685_v57 }
 0x703   : > { %v1102_v28 = vpop.f32.mrb[12].mxu1 }
 0x704   : > { %v1103_v29 = vadd.f32 %v1462_v27, %v1102_v28  ;;  %v1587_v30 = vpop.f32.mrb[13].mxu1 }
 0x705   : > { %v1105_v31 = vpop.f32.mrb[14].mxu1 }
 0x706   : > { %v2045_v32 = vadd.f32 %v1103_v29, %v1914_v0  ;;  %v1588_v33 = vpop.f32.mrb[15].mxu1  ;;  %v1677_v0 = vld [vmem:[%s2160_s7 + $0x8] sm:$0xff]  }
 0x707   : > { %1592 = vmatpush3.bf16.msra.mxu0 %v1677_v0 }
 0x708   : > { %v1111_v34 = vsel %vm424_vm0, %v2045_v32, 0.0 }
 0x709   : > { %1112 = vadd.xlane.f32.xlu1 %v1111_v34 }
 0x796   : > { %v1113_v35 = vpop.xlane.xlu1 %1112 }
 0x797   : > { %v1114_v36 = vmul.f32 0.03125, %v1113_v35 }
 0x799   : > { %v1115_v37 = vsub.f32 %v2045_v32, %v1114_v36 }
 0x79b   : > { %v1116_v38 = vmul.f32 %v1115_v37, %v1115_v37 }
 0x79d   : > { %v1117_v26 = vsel %vm424_vm0, %v1116_v38, 0.0 }
 0x79e   : > { %1118 = vadd.xlane.f32.xlu0 %v1117_v26 }
 0x82b   : > { %v1119_v40 = vpop.xlane.xlu0 %1118 }
 0x82c   : > { %v1120_v41 = vmul.f32 0.03125, %v1119_v40 }
 0x82e   : > { %v1121_v42 = vadd.f32 1e-05, %v1120_v41 }
 0x830   : > { %1704 = vrsqrt.f32 %v1121_v42 }
 0x83a   : > { %v1705_v43 = vpop.eup %1704 }
 0x83b   : > { %v1123_v45 = vmul.f32 %v1705_v43, %v1115_v37 }
 0x83d   : > { %v1128_v47 = vmul.f32 %v1466_v44, %v1123_v45 }
 0x83f   : > { %v1133_v48 = vadd.f32 %v1467_v46, %v1128_v47 }
 0x841   : > { %v1134_v49 = vpack.c.bf16 %v1133_v48, %v1133_v48 }
 0x843   : > { %1594 = vmatmul.mubr.msk.bf16.vlgmr.msra.gmra.mrb[24].mxu0 %vm424_vm0, %v1134_v49 }
 0x916   : > { %v1195_v59 = vpop.f32.mrb[24].mxu0 }
 0x917   : > { %v1196_v60 = vadd.f32 %v1468_v58, %v1195_v59  ;;  %v1595_v61 = vpop.f32.mrb[25].mxu0 }
 0x918   : > { %v1198_v62 = vpop.f32.mrb[26].mxu0 }
 0x919   : > { %v1472_v63 = vmul.f32 -1.702, %v1196_v60  ;;  %v1596_v1 = vpop.f32.mrb[27].mxu0 }
 0x91b   : > { %v1203_v2 = vmul.f32 1.442695, %v1472_v63 }
 0x91d   : > { %1706 = vpow2.f32 %v1203_v2 }
 0x927   : > { %v1707_v8 = vpop.eup %1706 }
 0x928   : > { %v1205_v3 = vadd.f32 1.0, %v1707_v8 }
 0x92a   : > { %1708 = vrcp.f32 %v1205_v3 }
 0x934   : > { %v1709_v4 = vpop.eup %1708 }
 0x935   : > { %v1208_v5 = vmul.f32 %v1709_v4, %v1196_v60 }
 0x937   : > { %v1209_v6 = vpack.c.bf16 %v1208_v5, %v1208_v5 }
 0x939   : > { %1614 = vmatmul.mubr.bf16.vlgmr.msra.gmra.mrb[16].mxu1 %v1209_v6 }
 0x93a   : > { %1723 = shalt.err (!%p1720_p3)
}
 0x93b   : > { %s1724_s25 = scalar_lea.hbm %s2105_s19, 128  ;;  %s1728_s2 = scalar_lea.hbm %s2165_s12, 256 }
 0x93c   : > { %p1725_p4 = scmp.ne.s32.totalorder %s2105_s19, %s1724_s25  ;;  %p1729_p9 = scmp.lt.u32.totalorder %s2105_s19, %s2165_s12 }
 0x93d   : > { %p1730_p10 = scmp.lt.u32.totalorder %s1728_s2, %s1724_s25  ;;  %p1732_p12 = scmp.lt.u32.totalorder %s1724_s25, %s2105_s19 }
 0x93e   : > { %p1726_p7 = pnand %p1725_p4, %p1894_p5 }
 0x93f   : > { %p1731_p11 = por %p1730_p10, %p1729_p9 }
 0x940   : > { %p1727_p8 = pneg %p1726_p7 }
 0x941   : > { %p1733_p13 = por %p1732_p12, %p1731_p11 }
 0x943   : > { %p1734_p0 = pnand %p1733_p13, %p1727_p8 }
 0x945   : > { %1737 = shalt.err (!%p1734_p0)
}
 0x946   : > { %1617 = dma.vmem_to_hbm [thread:$0]  (%p1894_p5), %s1354_s20, 128, %s2105_s19, %s1337_s28   ;;  %v1473_v7 = vld [vmem:[%s2163_s10] ss:$0 sm:$0xff] }
 0x947   : > { %s2183_s17 = sshll.u32 %s1906_s15, 3 }
 0x948   : > { %s419_s25 = scalar_lea.vmem %s2164_s11, %s2183_s17 }
 0xa0c   : > { %v1315_v9 = vpop.f32.mrb[16].mxu1 }
 0xa0d   : > { %v1316_v10 = vadd.f32 %v1473_v7, %v1315_v9  ;;  %v1615_v11 = vpop.f32.mrb[17].mxu1 }
 0xa0e   : > { %v1318_v12 = vpop.f32.mrb[18].mxu1 }
 0xa0f   : > { %v1321_v13 = vadd.f32 %v1316_v10, %v2045_v32  ;;  %v1616_v14 = vpop.f32.mrb[19].mxu1 }
 0xa11   : > { %1322 = vst.msk [vmem:[%s419_s25] sm:$0xff] %vm424_vm0, %v1321_v13 }
 0xa12 PF: > { %p1623_p5 = scmp.ge.s32.totalorder %s1772_s24, 2  ;;  %s1372_s13 = sand.u32 1, %s1760_s21  }
 0xa13   : > { %s1373_s20 = scalar_lea.sflag [#allocation5], %s1372_s13 }
 0xa14   : > { %p1620_p1 = pnand %p1623_p5, %p1898_p6 }
 0xa16   : > { %1755 = dma.done.wait (!%p1620_p1), %s1373_s20, 128  }
 0xa17   : > { %1757 = vsyncadd (!%p1620_p1), %s1373_s20, 4294967168  ;;  %p23_p2 = scmp.ge.s32.totalorder %s1881_s27, 4   ;;  %s2184_s21 = smov %s1764_s22 }
 0xa18   : > { %s2185_s22 = smov %s1768_s23  ;;  %s2186_s23 = smov %s1892_s30 }
 0xa19   : > { %s2187_s24 = smov %s1881_s27  ;;  %25 = sbr.rel (!%p23_p2) target bundleno = 9 (0x9), region = 122 }
 0xa20   :  { %1378 = vsyncpa [#allocation5], 1 }
 0xa21   :  { %1380 = vsyncpa [#allocation5 + $0x1], 1 }

// kernel: transformer_for_clip.2
= control target key start
LH: loop header
LB: loop body
LE: loop exit
PB: predicated region body
PF: predicated region fallthrough
CT: control target
= control target key end

     0   :  { %s1663_s17 = smov 0   ;;  %s1864_s0 = inlined_call_operand.vmem [shape: f32[2,8,32], index: 0, kind: input, shape index: {}]   ;;  %s1865_s1 = inlined_call_operand.vmem [shape: f32[2,32], index: 1, kind: input, shape index: {}]   ;;  %s1866_s2 = inlined_call_operand.vmem [shape: bf16[32,96], index: 2, kind: input, shape index: {}]   ;;  %s1867_s3 = inlined_call_operand.vmem [shape: f32[1,96], index: 3, kind: input, shape index: {}]   ;;  %s1868_s4 = inlined_call_operand.vmem [shape: bf16[32,32], index: 4, kind: input, shape index: {}]   ;;  %s1869_s5 = inlined_call_operand.vmem [shape: f32[1,32], index: 5, kind: input, shape index: {}]   ;;  %s1870_s6 = inlined_call_operand.vmem [shape: f32[2,32], index: 6, kind: input, shape index: {}]   ;;  %s1871_s7 = inlined_call_operand.vmem [shape: bf16[32,128], index: 7, kind: input, shape index: {}]   ;;  %s1872_s8 = inlined_call_operand.vmem [shape: f32[1,128], index: 8, kind: input, shape index: {}]   ;;  %s1873_s9 = inlined_call_operand.vmem [shape: bf16[128,32], index: 9, kind: input, shape index: {}]   ;;  %s1874_s10 = inlined_call_operand.vmem [shape: f32[1,32], index: 10, kind: input, shape index: {}]   ;;  %s1875_s11 = inlined_call_operand.vmem [shape: f32[2,8,32], index: 11, kind: output, shape index: {}]  }
   0x1 LB: > { %s1338_s18 = sadd.s32 4294967295, %s1585_s17   ;;  %p1342_p0 = scmp.ge.s32.totalorder %s1585_s17, 1  ;;  %s1585_s17 = sphi %s1663_s17, %s21_s17  }
   0x2   : > { %p336_p1 = scmp.lt.s32.totalorder %s1585_s17, 3 }
   0x4   : > { %p337_p2 = pnand %p1342_p0, %p336_p1 }
   0x5   : > { %p374_p3 = scmp.lt.s32.totalorder (!%p337_p2), %s1338_s18, 1  ;;  %vm386_vm0 = vcmask (!%p337_p2), 261120   ;;  %v1541_v7 = vld [vmem:[%s1866_s2] sm:$0xff] (!%p337_p2)   ;;  %v1587_v8 = vmov (!%p337_p2), 0.0   ;;  %vm1588_vm1 = vmmov (!%p337_p2), 0   ;;  %v1542_v9 = vld [vmem:[%s1866_s2 + $0x8] sm:$0xff] (!%p337_p2)  }
   0x6   : > { %340 = sbr.rel (%p337_p2) target bundleno = 2563 (0xa03), region = 64  ;;  %1425 = vmatprep.subr.bf16.mxu0 (!%p337_p2), %v1587_v8  ;;  %1429 = vmatprep.mubr.msk.bf16.mxu0 (!%p337_p2), %vm1588_vm1, %v1587_v8  ;;  %v1345_v14 = vld [vmem:[%s1865_s1] ss:$0 sm:$0xff] (!%p337_p2)  ;;  %v1346_v16 = vld [vmem:[%s1865_s1 + $0x1] ss:$0 sm:$0xff] (!%p337_p2)  ;;  %vm480_vm2 = vcmask (!%p337_p2), 60416  }
   0x7   : > { %1426 = vmatpush3.bf16.msra.mxu0 (!%p337_p2), %v1541_v7  ;;  %1445 = vmatprep.subr.bf16.mxu1 (!%p337_p2), %v1587_v8  ;;  %v1347_v20 = vld [vmem:[%s1867_s3] ss:$0 sm:$0xff] (!%p337_p2)  ;;  %s1589_s14 = smov (!%p337_p2), 80   ;;  %s1590_s15 = smov (!%p337_p2), 96   ;;  %vm556_vm3 = vcmask (!%p337_p2), 64512   ;;  %vm792_vm4 = vcmask (!%p337_p2), 1043456  }
   0x8   : > { %1427 = vmatprep.subr.bf16.mxu0 (!%p337_p2), %v1587_v8  ;;  %1447 = vmatprep.mubr.msk.bf16.mxu1 (!%p337_p2), %vm1588_vm1, %v1587_v8  ;;  %s1591_s16 = smov (!%p337_p2), 88   ;;  %s1592_s20 = smov (!%p337_p2), 72   ;;  %vm983_vm5 = vcmask (!%p337_p2), 126016   ;;  %vm992_vm6 = vcmask (!%p337_p2), 191616   ;;  %vm1001_vm7 = vcmask (!%p337_p2), 257216  }
   0x9   : > { %s1593_s21 = smov (!%p337_p2), 120   ;;  %s1595_s23 = smov (!%p337_p2), 104  }
   0xa   : > { %s1596_s24 = smov (!%p337_p2), 64   ;;  %s1597_s25 = smov (!%p337_p2), 48  }
   0xb   : > { %1428 = vmatpush3.bf16.msra.mxu0 (!%p337_p2), %v1542_v9  ;;  %s1598_s26 = smov (!%p337_p2), 40   ;;  %s1599_s27 = smov (!%p337_p2), 56  }
   0xc   : > { %1433 = vmatprep.subr.bf16.mxu0 (!%p337_p2), %v1587_v8  ;;  %s1600_s28 = smov (!%p337_p2), 16  }
   0xd   : > { %s1877_s18 = smov (!%p374_p3, %s1338_s18), 1 }
   0xe   : > { %s1343_s19 = sshll.u32 %s1877_s18, 3 }
   0xf   : > { %s377_s22 = scalar_lea.vmem %s1864_s0, %s1343_s19 }
  0x10   : > { %v1679_v0 = vld [vmem:[%s377_s22] sm:$0xff]  ;;  %s1594_s22 = smov 112  }
  0x11   : > { %v387_v1 = vsel %vm386_vm0, %v1679_v0, 0.0 }
  0x12   : > { %388 = vadd.xlane.f32.xlu0 %v387_v1 }
  0x9f   : > { %v389_v2 = vpop.xlane.xlu0 %388 }
  0xa0   : > { %v391_v3 = vmul.f32 0.03125, %v389_v2 }
  0xa2   : > { %v392_v4 = vsub.f32 %v1679_v0, %v391_v3 }
  0xa4   : > { %v393_v5 = vmul.f32 %v392_v4, %v392_v4 }
  0xa6   : > { %v394_v6 = vsel %vm386_vm0, %v393_v5, 0.0 }
  0xa7   : > { %395 = vadd.xlane.f32.xlu0 %v394_v6 }
 0x134   : > { %v396_v10 = vpop.xlane.xlu0 %395 }
 0x135   : > { %v397_v11 = vmul.f32 0.03125, %v396_v10 }
 0x137   : > { %v398_v12 = vadd.f32 1e-05, %v397_v11 }
 0x139   : > { %1555 = vrsqrt.f32 %v398_v12 }
 0x143   : > { %v1556_v13 = vpop.eup %1555 }
 0x144   : > { %v400_v15 = vmul.f32 %v1556_v13, %v392_v4 }
 0x146   : > { %v405_v17 = vmul.f32 %v1345_v14, %v400_v15 }
 0x148   : > { %v410_v18 = vadd.f32 %v1346_v16, %v405_v17 }
 0x14a   : > { %v411_v19 = vpack.c.bf16 %v410_v18, %v410_v18 }
 0x14c   : > { %1430 = vmatmul.mubr.msk.bf16.vlgmr.msra.gmra.mrb[0].mxu0 %vm386_vm0, %v411_v19 }
 0x14d   : > { %1435 = vmatprep.mubr.msk.bf16.mxu0 %vm1588_vm1, %v1587_v8 }
 0x21f   : > { %v472_v21 = vpop.f32.mrb[0].mxu0 }
 0x220   : > { %v473_v22 = vadd.f32 %v1347_v20, %v472_v21  ;;  %v1431_v23 = vpop.f32.mrb[1].mxu0 }
 0x221   : > { %v475_v24 = vpop.f32.mrb[2].mxu0 }
 0x222   : > { %v478_v25 = vmul.f32 0.35355338, %v473_v22  ;;  %v1711_v26 = vpack.c.bf16 %v473_v22, %v473_v22  ;;  %v1432_v27 = vpop.f32.mrb[3].mxu0 }
 0x224   : > { %v479_v28 = vpack.c.bf16 %v478_v25, %v478_v25  ;;  %519 = vrot.lane.b32.xlu0 %v1711_v26, %s1589_s14  ;;  %486 = vrot.lane.b32.xlu1 %v1711_v26, %s1590_s15  ;;  %s1601_s14 = smov 8   ;;  %s1602_s15 = smov 24  }
 0x226   : > { %481 = vst.msk [vmem:[#allocation2] sm:$0xf] %vm480_vm2, %v479_v28 }
 0x228   : > { %504 = vrot.lane.b32.xlu1 %v1711_v26, %s1591_s16  ;;  %s381_s16 = scalar_lea.vmem %s1875_s11, %s1343_s19 }
 0x22c   : > { %534 = vrot.lane.b32.xlu1 %v1711_v26, %s1592_s20 }
 0x22d   : > { %v544_v40 = vld [vmem:[#allocation2] sm:$0xf] }
 0x230   : > { %499 = vrot.lane.b32.xlu1 %v479_v28, %s1593_s21 }
 0x234   : > { %514 = vrot.lane.b32.xlu1 %v479_v28, %s1594_s22 }
 0x238   : > { %529 = vrot.lane.b32.xlu1 %v479_v28, %s1595_s23 }
 0x296   : > { %v520_v29 = vpop.permute.xlu0 %519  ;;  %v487_v30 = vpop.permute.xlu1 %486 }
 0x297   : > { %523 = vst.msk [vmem:[#allocation2 + $0x18] sm:$0xf] %vm480_vm2, %v520_v29  ;;  %490 = vst.msk [vmem:[#allocation2 + $0x10] sm:$0xf] %vm480_vm2, %v487_v30 }
 0x29a   : > { %v505_v31 = vpop.permute.xlu1 %504 }
 0x29b   : > { %508 = vst.msk [vmem:[#allocation2 + $0x14] sm:$0xf] %vm480_vm2, %v505_v31 }
 0x29e   : > { %v535_v32 = vpop.permute.xlu1 %534  ;;  %v548_v33 = vld [vmem:[#allocation2 + $0x10] sm:$0xf]  ;;  %v550_v34 = vld [vmem:[#allocation2 + $0x18] sm:$0xf] }
 0x29f   : > { %538 = vst.msk [vmem:[#allocation2 + $0x1c] sm:$0xf] %vm480_vm2, %v535_v32  ;;  %v561_v35 = vsel %vm556_vm3, %v548_v33, 0  ;;  %v653_v36 = vsel %vm556_vm3, %v550_v34, 0 }
 0x2a0   : > { %1434 = vmatpush3.bf16.xpose.msra.mxu0 %v561_v35  ;;  %1446 = vmatpush3.bf16.xpose.msra.mxu1 %v653_v36 }
 0x2a1   : > { %1439 = vmatprep.subr.bf16.mxu0 %v1587_v8  ;;  %1457 = vmatprep.subr.bf16.mxu1 %v1587_v8 }
 0x2a2   : > { %v500_v37 = vpop.permute.xlu1 %499  ;;  %v549_v38 = vld [vmem:[#allocation2 + $0x14] sm:$0xf] }
 0x2a3   : > { %503 = vst.msk [vmem:[#allocation2 + $0x4] sm:$0xf] %vm480_vm2, %v500_v37  ;;  %v607_v41 = vsel %vm556_vm3, %v549_v38, 0 }
 0x2a6   : > { %v515_v39 = vpop.permute.xlu1 %514  ;;  %v551_v43 = vld [vmem:[#allocation2 + $0x1c] sm:$0xf] }
 0x2a7   : > { %518 = vst.msk [vmem:[#allocation2 + $0x8] sm:$0xf] %vm480_vm2, %v515_v39  ;;  %1436 = vmatmul.mubr.msk.bf16.vlgmr.msra.gmra.mrb[4].mxu0 %vm556_vm3, %v544_v40  ;;  %v699_v46 = vsel %vm556_vm3, %v551_v43, 0 }
 0x2a8   : > { %1440 = vmatpush3.bf16.xpose.msra.mxu0 %v607_v41  ;;  %1441 = vmatprep.mubr.msk.bf16.mxu0 %vm1588_vm1, %v1587_v8 }
 0x2a9   : > { %1451 = vmatprep.subr.bf16.mxu0 %v1587_v8 }
 0x2aa   : > { %v530_v42 = vpop.permute.xlu1 %529  ;;  %v545_v44 = vld [vmem:[#allocation2 + $0x4] sm:$0xf] }
 0x2ab   : > { %533 = vst.msk [vmem:[#allocation2 + $0xc] sm:$0xf] %vm480_vm2, %v530_v42 }
 0x2ae   : > { %v546_v45 = vld [vmem:[#allocation2 + $0x8] sm:$0xf] }
 0x2af   : > { %1442 = vmatmul.mubr.msk.bf16.vlgmr.msra.gmra.mrb[8].mxu0 %vm556_vm3, %v545_v44  ;;  %1448 = vmatmul.mubr.msk.bf16.vlgmr.msra.gmra.mrb[0].mxu1 %vm556_vm3, %v546_v45 }
 0x2b0   : > { %1452 = vmatpush3.bf16.xpose.msra.mxu0 %v699_v46  ;;  %1453 = vmatprep.mubr.msk.bf16.mxu0 %vm1588_vm1, %v1587_v8 }
 0x2b1   : > { %1459 = vmatprep.mubr.msk.bf16.mxu1 %vm1588_vm1, %v1587_v8  ;;  %1463 = vmatprep.subr.bf16.mxu0 %v1587_v8 }
 0x2b2   : > { %v547_v47 = vld [vmem:[#allocation2 + $0xc] sm:$0xf] }
 0x2b7   : > { %1454 = vmatmul.mubr.msk.bf16.vlgmr.msra.gmra.mrb[12].mxu0 %vm556_vm3, %v547_v47 }
 0x2b8   : > { %1465 = vmatprep.mubr.msk.bf16.mxu0 %vm1588_vm1, %v1587_v8 }
 0x37a   : > { %v597_v48 = vpop.f32.mrb[4].mxu0 }
 0x37b   : > { %v1437_v49 = vpop.f32.mrb[5].mxu0  ;;  %v741_v50 = vsel %vm556_vm3, %v597_v48, -inf }
 0x37c   : > { %742 = vmax.xlane.f32.xlu1 %v741_v50  ;;  %v600_v51 = vpop.f32.mrb[6].mxu0 }
 0x37d   : > { %v1438_v52 = vpop.f32.mrb[7].mxu0 }
 0x382   : > { %v643_v53 = vpop.f32.mrb[8].mxu0  ;;  %v689_v54 = vpop.f32.mrb[0].mxu1 }
 0x383   : > { %v1443_v55 = vpop.f32.mrb[9].mxu0  ;;  %v1449_v56 = vpop.f32.mrb[1].mxu1  ;;  %v747_v57 = vsel %vm556_vm3, %v689_v54, -inf  ;;  %v744_v58 = vsel %vm556_vm3, %v643_v53, -inf }
 0x384   : > { %v692_v59 = vpop.f32.mrb[2].mxu1  ;;  %748 = vmax.xlane.f32.xlu1 %v747_v57  ;;  %745 = vmax.xlane.f32.xlu0 %v744_v58  ;;  %v646_v60 = vpop.f32.mrb[10].mxu0 }
 0x385   : > { %v1444_v61 = vpop.f32.mrb[11].mxu0  ;;  %v1450_v62 = vpop.f32.mrb[3].mxu1 }
 0x38a   : > { %v735_v63 = vpop.f32.mrb[12].mxu0 }
 0x38b   : > { %v1455_v1 = vpop.f32.mrb[13].mxu0  ;;  %v750_v2 = vsel %vm556_vm3, %v735_v63, -inf }
 0x38c   : > { %751 = vmax.xlane.f32.xlu0 %v750_v2  ;;  %v738_v3 = vpop.f32.mrb[14].mxu0  ;;  %v1543_v1 = vld [vmem:[%s1868_s4] sm:$0xff]  }
 0x38d   : > { %v1456_v4 = vpop.f32.mrb[15].mxu0  ;;  %v1544_v3 = vld [vmem:[%s1868_s4 + $0x8] sm:$0xff]  }
 0x395   : > { %491 = vrot.lane.b32.xlu1 %v1711_v26, %s1596_s24 }
 0x409   : > { %v743_v5 = vpop.xlane.xlu1 %742 }
 0x40a   : > { %v753_v6 = vsub.f32 %v597_v48, %v743_v5 }
 0x40c   : > { %v757_v7 = vmul.f32 1.442695, %v753_v6 }
 0x40e   : > { %1557 = vpow2.f32 %v757_v7 }
 0x411   : > { %v749_v9 = vpop.xlane.xlu1 %748  ;;  %v746_v10 = vpop.xlane.xlu0 %745 }
 0x412   : > { %v755_v11 = vsub.f32 %v689_v54, %v749_v9  ;;  %v754_v12 = vsub.f32 %v643_v53, %v746_v10 }
 0x414   : > { %v761_v13 = vmul.f32 1.442695, %v755_v11  ;;  %v759_v14 = vmul.f32 1.442695, %v754_v12 }
 0x415   : > { %v492_v15 = vpop.permute.xlu1 %491 }
 0x416   : > { %1559 = vpow2.f32 %v761_v13  ;;  %495 = vst.msk [vmem:[#allocation2 + $0x20] sm:$0xf] %vm480_vm2, %v492_v15 }
 0x417   : > { %1561 = vpow2.f32 %v759_v14 }
 0x418   : > { %v1558_v16 = vpop.eup %1557 }
 0x419   : > { %v752_v17 = vpop.xlane.xlu0 %751  ;;  %v765_v18 = vsel %vm556_vm3, %v1558_v16, 0.0 }
 0x41a   : > { %v756_v19 = vsub.f32 %v735_v63, %v752_v17  ;;  %766 = vadd.xlane.f32.xlu1 %v765_v18  ;;  %v1364_v18 = vld [vmem:[%s1869_s5] ss:$0 sm:$0xff] }
 0x41c   : > { %v763_v20 = vmul.f32 1.442695, %v756_v19 }
 0x41d   : > { %v552_v21 = vld [vmem:[#allocation2 + $0x20] sm:$0xf] }
 0x41e   : > { %1563 = vpow2.f32 %v763_v20  ;;  %v794_v22 = vsel %vm792_vm4, %v552_v21, 0 }
 0x41f   : > { %1458 = vmatpush3.bf16.msra.mxu1 %v794_v22 }
 0x420   : > { %v1560_v23 = vpop.eup %1559  ;;  %1469 = vmatprep.subr.bf16.mxu1 %v1587_v8 }
 0x421   : > { %v1562_v24 = vpop.eup %1561  ;;  %v771_v25 = vsel %vm556_vm3, %v1560_v23, 0.0 }
 0x422   : > { %772 = vadd.xlane.f32.xlu1 %v771_v25  ;;  %v768_v27 = vsel %vm556_vm3, %v1562_v24, 0.0 }
 0x423   : > { %769 = vadd.xlane.f32.xlu0 %v768_v27 }
 0x428   : > { %v1564_v28 = vpop.eup %1563 }
 0x429   : > { %v774_v29 = vsel %vm556_vm3, %v1564_v28, 0.0 }
 0x42a   : > { %775 = vadd.xlane.f32.xlu0 %v774_v29 }
 0x433   : > { %524 = vrot.lane.b32.xlu1 %v1711_v26, %s1597_s25 }
 0x437   : > { %539 = vrot.lane.b32.xlu1 %v1711_v26, %s1598_s26 }
 0x440   : > { %509 = vrot.lane.b32.xlu0 %v1711_v26, %s1599_s27 }
 0x4a7   : > { %v767_v30 = vpop.xlane.xlu1 %766 }
 0x4a8   : > { %1565 = vrcp.f32 %v767_v30 }
 0x4af   : > { %v773_v31 = vpop.xlane.xlu1 %772 }
 0x4b0   : > { %1567 = vrcp.f32 %v773_v31  ;;  %v770_v33 = vpop.xlane.xlu0 %769 }
 0x4b1   : > { %1569 = vrcp.f32 %v770_v33 }
 0x4b2   : > { %v1566_v32 = vpop.eup %1565 }
 0x4b3   : > { %v781_v34 = vmul.f32 %v1566_v32, %v1558_v16  ;;  %v525_v35 = vpop.permute.xlu1 %524  ;;  %v1545_v32 = vld [vmem:[%s1871_s7] sm:$0xff]  }
 0x4b4   : > { %528 = vst.msk [vmem:[#allocation2 + $0x28] sm:$0xf] %vm480_vm2, %v525_v35 }
 0x4b5   : > { %v785_v36 = vpack.c.bf16 %v781_v34, %v781_v34 }
 0x4b7   : > { %1460 = vmatmul.mubr.msk.bf16.vlgmr.msra.gmra.mrb[4].mxu1 %vm556_vm3, %v785_v36  ;;  %v540_v37 = vpop.permute.xlu1 %539  ;;  %v776_v38 = vpop.xlane.xlu0 %775 }
 0x4b8   : > { %543 = vst.msk [vmem:[#allocation2 + $0x2c] sm:$0xf] %vm480_vm2, %v540_v37  ;;  %1471 = vmatprep.mubr.msk.bf16.mxu1 %vm1588_vm1, %v1587_v8  ;;  %1571 = vrcp.f32 %v776_v38  ;;  %v1368_v37 = vld [vmem:[%s1870_s6] ss:$0 sm:$0xff] }
 0x4ba   : > { %v1568_v26 = vpop.eup %1567 }
 0x4bb   : > { %v783_v39 = vmul.f32 %v1568_v26, %v1560_v23  ;;  %v510_v40 = vpop.permute.xlu0 %509  ;;  %v554_v41 = vld [vmem:[#allocation2 + $0x28] sm:$0xf]  ;;  %v1570_v44 = vpop.eup %1569  ;;  %v1369_v26 = vld [vmem:[%s1870_s6 + $0x1] ss:$0 sm:$0xff] }
 0x4bc   : > { %513 = vst.msk [vmem:[#allocation2 + $0x24] sm:$0xf] %vm480_vm2, %v510_v40  ;;  %v886_v42 = vsel %vm792_vm4, %v554_v41, 0  ;;  %v782_v45 = vmul.f32 %v1570_v44, %v1562_v24  ;;  %v1549_v44 = vld [vmem:[%s1873_s9 + $0x10] sm:$0xff]  }
 0x4bd   : > { %1470 = vmatpush3.bf16.msra.mxu1 %v886_v42  ;;  %v787_v43 = vpack.c.bf16 %v783_v39, %v783_v39  ;;  %v1547_v42 = vld [vmem:[%s1873_s9] sm:$0xff]  }
 0x4be   : > { %1481 = vmatprep.subr.bf16.mxu1 %v1587_v8  ;;  %v786_v49 = vpack.c.bf16 %v782_v45, %v782_v45  ;;  %v1550_v45 = vld [vmem:[%s1873_s9 + $0x18] sm:$0xff]  }
 0x4bf   : > { %v555_v48 = vld [vmem:[#allocation2 + $0x2c] sm:$0xf] }
 0x4c0   : > { %1472 = vmatmul.mubr.msk.bf16.vlgmr.msra.gmra.mrb[8].mxu1 %vm556_vm3, %v787_v43  ;;  %v932_v51 = vsel %vm792_vm4, %v555_v48, 0  ;;  %v1548_v43 = vld [vmem:[%s1873_s9 + $0x8] sm:$0xff]   ;;  %v1553_v48 = vld [vmem:[%s1873_s9 + $0x30] sm:$0xff]  }
 0x4c1   : > { %1485 = vmatprep.mubr.msk.bf16.mxu1 %vm1588_vm1, %v1587_v8  ;;  %1482 = vmatpush3.bf16.msra.mxu1 %v1543_v1 }
 0x4c2   : > { %v1572_v50 = vpop.eup %1571  ;;  %1483 = vmatprep.subr.bf16.mxu1 %v1587_v8 }
 0x4c3   : > { %v553_v46 = vld [vmem:[#allocation2 + $0x24] sm:$0xf]  ;;  %v784_v52 = vmul.f32 %v1572_v50, %v1564_v28  ;;  %v1370_v50 = vld [vmem:[%s1872_s8] ss:$0 sm:$0xff] }
 0x4c4   : > { %v840_v47 = vsel %vm792_vm4, %v553_v46, 0  ;;  %v1551_v46 = vld [vmem:[%s1873_s9 + $0x20] sm:$0xff]  }
 0x4c5   : > { %1464 = vmatpush3.bf16.msra.mxu0 %v840_v47  ;;  %v788_v53 = vpack.c.bf16 %v784_v52, %v784_v52  ;;  %1484 = vmatpush3.bf16.msra.mxu1 %v1544_v3  ;;  %v1552_v47 = vld [vmem:[%s1873_s9 + $0x28] sm:$0xff]  }
 0x4c6   : > { %1475 = vmatprep.subr.bf16.mxu0 %v1587_v8  ;;  %1497 = vmatprep.subr.bf16.mxu1 %v1587_v8 }
 0x4c8   : > { %1466 = vmatmul.mubr.msk.bf16.vlgmr.msra.gmra.mrb[16].mxu0 %vm556_vm3, %v786_v49  ;;  %v1554_v49 = vld [vmem:[%s1873_s9 + $0x38] sm:$0xff]  }
 0x4c9   : > { %1476 = vmatpush3.bf16.msra.mxu0 %v932_v51  ;;  %1477 = vmatprep.mubr.msk.bf16.mxu0 %vm1588_vm1, %v1587_v8 }
 0x4ca   : > { %1489 = vmatprep.subr.bf16.mxu0 %v1587_v8 }
 0x4d0   : > { %1478 = vmatmul.mubr.msk.bf16.vlgmr.msra.gmra.mrb[20].mxu0 %vm556_vm3, %v788_v53 }
 0x4d1   : > { %1493 = vmatprep.mubr.msk.bf16.mxu0 %vm1588_vm1, %v1587_v8  ;;  %1490 = vmatpush3.bf16.msra.mxu0 %v1545_v32 }
 0x4d2   : > { %1491 = vmatprep.subr.bf16.mxu0 %v1587_v8 }
 0x58a   : > { %v830_v54 = vpop.f32.mrb[4].mxu1 }
 0x58b   : > { %v974_v55 = vpack.c.bf16 %v830_v54, %v830_v54  ;;  %v1461_v56 = vpop.f32.mrb[5].mxu1 }
 0x58c   : > { %v833_v57 = vpop.f32.mrb[6].mxu1 }
 0x58d   : > { %975 = vst.msk [vmem:[#allocation3] sm:$0xf] %vm480_vm2, %v974_v55  ;;  %v1462_v58 = vpop.f32.mrb[7].mxu1 }
 0x593   : > { %v922_v59 = vpop.f32.mrb[8].mxu1 }
 0x594   : > { %v1389_v60 = vpack.c.bf16 %v922_v59, %v922_v59  ;;  %v1473_v61 = vpop.f32.mrb[9].mxu1 }
 0x595   : > { %v925_v62 = vpop.f32.mrb[10].mxu1 }
 0x596   : > { %989 = vrot.lane.b32.xlu1 %v1389_v60, %s1600_s28  ;;  %v1474_v63 = vpop.f32.mrb[11].mxu1  ;;  %v1375_v62 = vld [vmem:[%s1874_s10] ss:$0 sm:$0xff] }
 0x59b   : > { %v876_v2 = vpop.f32.mrb[16].mxu0 }
 0x59c   : > { %v1388_v4 = vpack.c.bf16 %v876_v2, %v876_v2  ;;  %v1467_v5 = vpop.f32.mrb[17].mxu0 }
 0x59d   : > { %v879_v6 = vpop.f32.mrb[18].mxu0 }
 0x59e   : > { %980 = vrot.lane.b32.xlu0 %v1388_v4, %s1601_s14  ;;  %v1468_v7 = vpop.f32.mrb[19].mxu0 }
 0x5a3   : > { %v968_v9 = vpop.f32.mrb[20].mxu0 }
 0x5a4   : > { %v1390_v10 = vpack.c.bf16 %v968_v9, %v968_v9  ;;  %v1479_v11 = vpop.f32.mrb[21].mxu0 }
 0x5a5   : > { %v971_v12 = vpop.f32.mrb[22].mxu0 }
 0x5a6   : > { %998 = vrot.lane.b32.xlu0 %v1390_v10, %s1602_s15  ;;  %v1480_v13 = vpop.f32.mrb[23].mxu0 }
 0x608   : > { %v990_v15 = vpop.permute.xlu1 %989 }
 0x610   : > { %v981_v14 = vpop.permute.xlu0 %980 }
 0x611   : > { %984 = vst.msk [vmem:[#allocation3] sm:$0xf] %vm983_vm5, %v981_v14 }
 0x612   : > { %993 = vst.msk [vmem:[#allocation3] sm:$0xf] %vm992_vm6, %v990_v15 }
 0x618   : > { %v999_v16 = vpop.permute.xlu0 %998 }
 0x619   : > { %1002 = vst.msk [vmem:[#allocation3] sm:$0xf] %vm1001_vm7, %v999_v16 }
 0x620   : > { %v1003_v17 = vld [vmem:[#allocation3] sm:$0xf] }
 0x621   : > { %1486 = vmatmul.mubr.msk.bf16.vlgmr.msra.gmra.mrb[12].mxu1 %vm386_vm0, %v1003_v17 }
 0x622   : > { %1513 = vmatprep.mubr.msk.bf16.mxu1 %vm1588_vm1, %v1587_v8  ;;  %1498 = vmatpush3.bf16.msra.mxu1 %v1547_v42 }
 0x623   : > { %1499 = vmatprep.subr.bf16.mxu1 %v1587_v8 }
 0x626   : > { %1500 = vmatpush3.bf16.msra.mxu1 %v1548_v43 }
 0x627   : > { %1501 = vmatprep.subr.bf16.mxu1 %v1587_v8 }
 0x62a   : > { %1502 = vmatpush3.bf16.msra.mxu1 %v1549_v44 }
 0x62b   : > { %1503 = vmatprep.subr.bf16.mxu1 %v1587_v8 }
 0x62e   : > { %1504 = vmatpush3.bf16.msra.mxu1 %v1550_v45 }
 0x62f   : > { %1505 = vmatprep.subr.bf16.mxu1 %v1587_v8 }
 0x632   : > { %1506 = vmatpush3.bf16.msra.mxu1 %v1551_v46 }
 0x633   : > { %1507 = vmatprep.subr.bf16.mxu1 %v1587_v8 }
 0x636   : > { %1508 = vmatpush3.bf16.msra.mxu1 %v1552_v47 }
 0x637   : > { %1509 = vmatprep.subr.bf16.mxu1 %v1587_v8 }
 0x63a   : > { %1510 = vmatpush3.bf16.msra.mxu1 %v1553_v48 }
 0x63b   : > { %1511 = vmatprep.subr.bf16.mxu1 %v1587_v8 }
 0x63e   : > { %1512 = vmatpush3.bf16.msra.mxu1 %v1554_v49 }
 0x6f4   : > { %v1064_v19 = vpop.f32.mrb[12].mxu1 }
 0x6f5   : > { %v1065_v20 = vadd.f32 %v1364_v18, %v1064_v19  ;;  %v1487_v21 = vpop.f32.mrb[13].mxu1 }
 0x6f6   : > { %v1067_v22 = vpop.f32.mrb[14].mxu1 }
 0x6f7   : > { %v1797_v23 = vadd.f32 %v1065_v20, %v1679_v0  ;;  %v1488_v24 = vpop.f32.mrb[15].mxu1  ;;  %v1546_v0 = vld [vmem:[%s1871_s7 + $0x8] sm:$0xff]  }
 0x6f8   : > { %1492 = vmatpush3.bf16.msra.mxu0 %v1546_v0 }
 0x6f9   : > { %v1073_v25 = vsel %vm386_vm0, %v1797_v23, 0.0 }
 0x6fa   : > { %1074 = vadd.xlane.f32.xlu1 %v1073_v25 }
 0x787   : > { %v1075_v27 = vpop.xlane.xlu1 %1074 }
 0x788   : > { %v1076_v28 = vmul.f32 0.03125, %v1075_v27 }
 0x78a   : > { %v1077_v29 = vsub.f32 %v1797_v23, %v1076_v28 }
 0x78c   : > { %v1078_v30 = vmul.f32 %v1077_v29, %v1077_v29 }
 0x78e   : > { %v1079_v31 = vsel %vm386_vm0, %v1078_v30, 0.0 }
 0x78f   : > { %1080 = vadd.xlane.f32.xlu0 %v1079_v31 }
 0x81c   : > { %v1081_v33 = vpop.xlane.xlu0 %1080 }
 0x81d   : > { %v1082_v34 = vmul.f32 0.03125, %v1081_v33 }
 0x81f   : > { %v1083_v35 = vadd.f32 1e-05, %v1082_v34 }
 0x821   : > { %1573 = vrsqrt.f32 %v1083_v35 }
 0x82b   : > { %v1574_v36 = vpop.eup %1573 }
 0x82c   : > { %v1085_v38 = vmul.f32 %v1574_v36, %v1077_v29 }
 0x82e   : > { %v1090_v39 = vmul.f32 %v1368_v37, %v1085_v38 }
 0x830   : > { %v1095_v40 = vadd.f32 %v1369_v26, %v1090_v39 }
 0x832   : > { %v1096_v41 = vpack.c.bf16 %v1095_v40, %v1095_v40 }
 0x834   : > { %1494 = vmatmul.mubr.msk.bf16.vlgmr.msra.gmra.mrb[24].mxu0 %vm386_vm0, %v1096_v41 }
 0x907   : > { %v1157_v51 = vpop.f32.mrb[24].mxu0 }
 0x908   : > { %v1158_v52 = vadd.f32 %v1370_v50, %v1157_v51  ;;  %v1495_v53 = vpop.f32.mrb[25].mxu0 }
 0x909   : > { %v1160_v54 = vpop.f32.mrb[26].mxu0 }
 0x90a   : > { %v1374_v55 = vmul.f32 -1.702, %v1158_v52  ;;  %v1496_v56 = vpop.f32.mrb[27].mxu0 }
 0x90c   : > { %v1165_v57 = vmul.f32 1.442695, %v1374_v55 }
 0x90e   : > { %1575 = vpow2.f32 %v1165_v57 }
 0x918   : > { %v1576_v58 = vpop.eup %1575 }
 0x919   : > { %v1167_v8 = vadd.f32 1.0, %v1576_v58 }
 0x91b   : > { %1577 = vrcp.f32 %v1167_v8 }
 0x925   : > { %v1578_v59 = vpop.eup %1577 }
 0x926   : > { %v1170_v60 = vmul.f32 %v1578_v59, %v1158_v52 }
 0x928   : > { %v1171_v61 = vpack.c.bf16 %v1170_v60, %v1170_v60 }
 0x92a   : > { %1514 = vmatmul.mubr.bf16.vlgmr.msra.gmra.mrb[16].mxu1 %v1171_v61 }
 0x9fd   : > { %v1277_v63 = vpop.f32.mrb[16].mxu1 }
 0x9fe   : > { %v1278_v1 = vadd.f32 %v1375_v62, %v1277_v63  ;;  %v1515_v2 = vpop.f32.mrb[17].mxu1 }
 0x9ff   : > { %v1280_v3 = vpop.f32.mrb[18].mxu1 }
 0xa00   : > { %v1283_v4 = vadd.f32 %v1278_v1, %v1797_v23  ;;  %v1516_v5 = vpop.f32.mrb[19].mxu1 }
 0xa02   : > { %1284 = vst.msk [vmem:[%s381_s16] sm:$0xff] %vm386_vm0, %v1283_v4 }
 0xa03 PF: > { %s21_s17 = sadd.s32 1, %s1585_s17  }
 0xa04   : > { %p18_p4 = scmp.ge.s32.totalorder %s21_s17, 4  }
 0xa06   :  { %20 = sbr.rel (!%p18_p4) target bundleno = 1 (0x1), region = 105 }

</bundles_post_ra>
